<compile_context>
chip_gen: v6e
topology: v6e:2x2x1
jax: 0.10.0
libtpu: 0.0.40
codegen_flags: <defaults>
</compile_context>

<pallas_src>
from functools import partial

import jax
import jax.numpy as jnp
from jax.experimental import pallas as pl
from jax.experimental.pallas import tpu as pltpu


def _hardswish(x):
    # x * hardtanh(x + 3, 0, 6) / 6, written with a multiply instead of a divide.
    return x * jnp.clip(x + 3.0, 0.0, 6.0) * (1.0 / 6.0)


def _bottleneck_kernel(x_ref, w1_ref, b1_ref, w2_ref, b2_ref, o_ref, ybuf_ref,
                       *, H, W, C1, C_, C2, add):
    # ---- cv1: 1x1 conv as (H*W, C1) @ (C1, C_) on the MXU (bf16 in, f32 accumulate).
    #      BN scale already folded into w1; epilogue is bias + hardswish only. ----
    xb = x_ref[0].reshape(H * W, C1).astype(jnp.bfloat16)
    y = jnp.dot(xb, w1_ref[...], preferred_element_type=jnp.float32)   # (H*W, C_) f32
    y = _hardswish(y + b1_ref[...])
    yb = y.reshape(H, W, C_)                                           # f32

    # ---- hoist the dj (W-direction) shifts out of the tap loop:
    #      build a channel-stacked, dj-pre-shifted copy of the cv1 output once per step.
    #      stacked[h, j, dj*C_:(dj+1)*C_] == y_pad[h+1, j+dj]  (zero outside the image). ----
    col = jax.lax.broadcasted_iota(jnp.int32, (H, W, C_), 1)
    zero = jnp.zeros_like(yb)
    y_l = jnp.where(col == 0, zero, pltpu.roll(yb, shift=1, axis=1))        # y[h, j-1]
    y_r = jnp.where(col == W - 1, zero, pltpu.roll(yb, shift=W - 1, axis=1))  # y[h, j+1]
    stacked = jnp.concatenate([y_l, yb, y_r], axis=-1).astype(jnp.bfloat16)   # (H, W, 3*C_)

    # Only the two halo rows are zeroed each step (megacore-safe, no program_id gating);
    # the interior is fully overwritten.
    zrow = jnp.zeros((W, 3 * C_), jnp.bfloat16)
    ybuf_ref[0] = zrow
    ybuf_ref[H + 1] = zrow
    ybuf_ref[1:H + 1] = stacked

    # ---- cv2: 3x3 conv (stride 1, pad 1) as 3 accumulated matmuls with K = 3*C_.
    #      Each tap is a pure row-offset slice of the scratch (no sublane/lane shifts). ----
    acc = jnp.zeros((H * W, C2), jnp.float32)
    for di in range(3):
        tap = ybuf_ref[di:di + H]                                       # (H, W, 3*C_) bf16
        acc = acc + jnp.dot(tap.reshape(H * W, 3 * C_), w2_ref[di],
                            preferred_element_type=jnp.float32)
    z = _hardswish(acc + b2_ref[...])

    if add:  # shortcut and C1 == C2; re-read x (still VMEM-resident) to keep its live range short
        z = z + x_ref[0].reshape(H * W, C1)
    o_ref[0] = z.reshape(H, W, C2).astype(o_ref.dtype)


def _vmem_limit_bytes(H, W, C1, C_, C2):
    f32, bf16 = 4, 2
    io = 2 * (H * W * C1 * f32 + H * W * C2 * f32)                     # double-buffered in/out
    wts = 2 * (C1 * C_ * bf16 + 3 * (3 * C_) * C2 * bf16 + (C_ + C2) * f32)
    scratch = (H + 2) * W * 3 * C_ * bf16                              # dj-stacked cv1 output
    live = H * W * (C1 + 4 * C_ + 2 * C2) * f32                        # in-register temporaries
    est = io + wts + scratch + live
    try:
        cap = int(pltpu.get_tpu_info().vmem_capacity_bytes * 0.85)     # leave compiler headroom
    except Exception:
        cap = 48 << 20
    return int(min(max(2 * est, 8 << 20), cap))


def bottleneck_forward_nhwc(x_nhwc, params, shortcut=True):
    """x_nhwc: (N, H, W, C1) float32. Returns (N, H, W, C2) float32."""
    w1, s1, b1, w2, s2, b2 = params
    N, H, W, C1 = x_nhwc.shape
    C_ = w1.shape[1]
    C2 = w2.shape[-1]
    add = bool(shortcut and C1 == C2)

    # Fold the BN scales into the conv weights (fold in f32, then cast to bf16 for the MXU).
    w1f = (w1.astype(jnp.float32) * s1[None, :].astype(jnp.float32)).astype(jnp.bfloat16)
    w2f = (w2.astype(jnp.float32) * s2[None, None, None, :].astype(jnp.float32))
    w2f = w2f.reshape(3, 3 * C_, C2).astype(jnp.bfloat16)   # (di, dj*C_ + cin, cout) stacked-K
    b1r = b1.reshape(1, C_).astype(jnp.float32)
    b2r = b2.reshape(1, C2).astype(jnp.float32)

    kernel = partial(_bottleneck_kernel, H=H, W=W, C1=C1, C_=C_, C2=C2, add=add)
    return pl.pallas_call(
        kernel,
        out_shape=jax.ShapeDtypeStruct((N, H, W, C2), jnp.float32),
        grid_spec=pltpu.PrefetchScalarGridSpec(
            num_scalar_prefetch=0,
            grid=(N,),
            in_specs=[
                pl.BlockSpec((1, H, W, C1), lambda n: (n, 0, 0, 0)),
                pl.BlockSpec((C1, C_), lambda n: (0, 0)),
                pl.BlockSpec((1, C_), lambda n: (0, 0)),
                pl.BlockSpec((3, 3 * C_, C2), lambda n: (0, 0, 0)),
                pl.BlockSpec((1, C2), lambda n: (0, 0)),
            ],
            out_specs=pl.BlockSpec((1, H, W, C2), lambda n: (n, 0, 0, 0)),
            scratch_shapes=[
                pltpu.VMEM((H + 2, W, 3 * C_), jnp.bfloat16),   # dj-shifted, channel-stacked cv1 out
            ],
        ),
        compiler_params=pltpu.CompilerParams(
            dimension_semantics=("parallel",),
            vmem_limit_bytes=_vmem_limit_bytes(H, W, C1, C_, C2),
        ),
    )(x_nhwc.astype(jnp.float32), w1f, b1r, w2f, b2r)


def bottleneck_forward(x_nchw, params, shortcut=True):
    """NCHW wrapper matching the PyTorch module's convention."""
    x = jnp.transpose(x_nchw, (0, 2, 3, 1))
    out = bottleneck_forward_nhwc(x, params, shortcut=shortcut)
    return jnp.transpose(out, (0, 3, 1, 2))


def _fold_bn(gamma, beta, mean, var, eps=1e-5):
    scale = gamma / jnp.sqrt(var + eps)
    bias = beta - mean * scale
    return scale, bias


def init_params(key, c1, c2, e=0.5):
    """Deterministic synthetic parameters matching Bottleneck(c1, c2) shapes (eval-mode BN folded)."""
    c_ = int(c2 * e)
    keys = jax.random.split(key, 10)

    # cv1: Conv2d(c1, c_, 1, bias=False): torch weight (c_, c1, 1, 1) -> matmul form (c1, c_)
    w1 = jax.random.normal(keys[0], (c1, c_), jnp.float32) / jnp.sqrt(c1)
    g1 = 1.0 + 0.1 * jax.random.normal(keys[1], (c_,), jnp.float32)
    be1 = 0.1 * jax.random.normal(keys[2], (c_,), jnp.float32)
    mu1 = 0.1 * jax.random.normal(keys[3], (c_,), jnp.float32)
    v1 = 1.0 + 0.1 * jnp.abs(jax.random.normal(keys[4], (c_,), jnp.float32))
    s1, b1 = _fold_bn(g1, be1, mu1, v1)

    # cv2: Conv2d(c_, c2, 3, padding=1, bias=False): torch (c2, c_, 3, 3) -> HWIO (3, 3, c_, c2)
    w2 = jax.random.normal(keys[5], (3, 3, c_, c2), jnp.float32) / jnp.sqrt(9 * c_)
    g2 = 1.0 + 0.1 * jax.random.normal(keys[6], (c2,), jnp.float32)
    be2 = 0.1 * jax.random.normal(keys[7], (c2,), jnp.float32)
    mu2 = 0.1 * jax.random.normal(keys[8], (c2,), jnp.float32)
    v2 = 1.0 + 0.1 * jnp.abs(jax.random.normal(keys[9], (c2,), jnp.float32))
    s2, b2 = _fold_bn(g2, be2, mu2, v2)

    return (w1, s1, b1, w2, s2, b2)


def bottleneck_reference(x_nchw, params, shortcut=True):
    """Pure-JAX reference (NCHW), mirroring the kernel's mixed precision
    (BN scales folded into bf16 weights, f32 accumulation/epilogue), eval-mode BN."""
    w1, s1, b1, w2, s2, b2 = params
    x = jnp.transpose(x_nchw, (0, 2, 3, 1)).astype(jnp.float32)
    c_ = w1.shape[1]
    c2 = w2.shape[-1]

    w1f = (w1 * s1[None, :]).astype(jnp.bfloat16)
    w2f = (w2 * s2[None, None, None, :]).astype(jnp.bfloat16)

    y = jnp.einsum("nhwc,cd->nhwd", x.astype(jnp.bfloat16), w1f,
                   preferred_element_type=jnp.float32)
    y = _hardswish(y + b1.reshape(1, 1, 1, c_))

    z = jax.lax.conv_general_dilated(
        y.astype(jnp.bfloat16), w2f,
        window_strides=(1, 1), padding=((1, 1), (1, 1)),
        dimension_numbers=("NHWC", "HWIO", "NHWC"),
        preferred_element_type=jnp.float32)
    z = _hardswish(z + b2.reshape(1, 1, 1, c2))

    out = x + z if (shortcut and x.shape[-1] == c2) else z
    return jnp.transpose(out, (0, 3, 1, 2))


if __name__ == "__main__":
    key = jax.random.PRNGKey(0)
    k_x, k_p = jax.random.split(key)

    # c1 == c2 == 128 exercises the residual shortcut and keeps the input/output channel
    # dims lane-aligned (the hidden dim is c_ = 64; it is stacked 3x along K for cv2).
    N, C1, C2, H, W = 2, 128, 128, 16, 16
    x = jax.random.normal(k_x, (N, C1, H, W), jnp.float32)
    params = init_params(k_p, C1, C2)

    out = jax.block_until_ready(bottleneck_forward(x, params, shortcut=True))
    ref = jax.block_until_ready(bottleneck_reference(x, params, shortcut=True))

    assert out.shape == (N, C2, H, W), out.shape
    max_err = float(jnp.max(jnp.abs(out - ref)))
    assert jnp.allclose(out, ref, rtol=5e-3, atol=5e-3), max_err

    print("KERNEL_OK")
</pallas_src>

<mosaic_0001>
module attributes {stable_mosaic.version = 11 : i64} {
  func.func @_bottleneck_kernel(%arg0: i32, %arg1: memref<1x16x16x128xf32, #tpu.memory_space<vmem>>, %arg2: memref<128x64xbf16, #tpu.memory_space<vmem>>, %arg3: memref<1x64xf32, #tpu.memory_space<vmem>>, %arg4: memref<3x192x128xbf16, #tpu.memory_space<vmem>>, %arg5: memref<1x128xf32, #tpu.memory_space<vmem>>, %arg6: memref<1x16x16x128xf32, #tpu.memory_space<vmem>>, %arg7: memref<18x16x192xbf16, #tpu.memory_space<vmem>>) attributes {dimension_semantics = [#tpu.dimension_semantics<parallel>], iteration_bounds = array<i64: 2>, scalar_prefetch = 0 : i64, scratch_operands = 1 : i64, tpu.core_type = #tpu.core_type<tc>, window_params = [{transform_indices = @transform_0, window_bounds = array<i64: 1, 16, 16, 128>}, {pipeline_mode = #tpu.pipeline_mode<synchronous>, transform_indices = @transform_1, window_bounds = array<i64: 128, 64>}, {pipeline_mode = #tpu.pipeline_mode<synchronous>, transform_indices = @transform_2, window_bounds = array<i64: 1, 64>}, {pipeline_mode = #tpu.pipeline_mode<synchronous>, transform_indices = @transform_3, window_bounds = array<i64: 3, 192, 128>}, {pipeline_mode = #tpu.pipeline_mode<synchronous>, transform_indices = @transform_4, window_bounds = array<i64: 1, 128>}, {transform_indices = @transform_5, window_bounds = array<i64: 1, 16, 16, 128>}]} {
    %c0 = arith.constant 0 : index
    %c0_0 = arith.constant 0 : index
    %c0_1 = arith.constant 0 : index
    %c0_2 = arith.constant 0 : index
    %0 = vector.load %arg1[%c0, %c0_0, %c0_1, %c0_2] : memref<1x16x16x128xf32, #tpu.memory_space<vmem>>, vector<1x16x16x128xf32>
    %1 = vector.shape_cast %0 : vector<1x16x16x128xf32> to vector<16x16x128xf32>
    %2 = vector.shape_cast %1 : vector<16x16x128xf32> to vector<256x128xf32>
    %3 = arith.truncf %2 : vector<256x128xf32> to vector<256x128xbf16>
    %c0_3 = arith.constant 0 : index
    %c0_4 = arith.constant 0 : index
    %4 = vector.load %arg2[%c0_3, %c0_4] : memref<128x64xbf16, #tpu.memory_space<vmem>>, vector<128x64xbf16>
    %cst = arith.constant dense<0.000000e+00> : vector<256x64xf32>
    %5 = tpu.matmul %3, %4, %cst {dimension_numbers = #tpu.dot_dimension_numbers<[1], [0], [0], [1], [0, 0, 1, 1], [], []>} : vector<256x128xbf16>, vector<128x64xbf16>, vector<256x64xf32> -> vector<256x64xf32>
    %c0_5 = arith.constant 0 : index
    %c0_6 = arith.constant 0 : index
    %6 = vector.load %arg3[%c0_5, %c0_6] : memref<1x64xf32, #tpu.memory_space<vmem>>, vector<1x64xf32>
    %7 = vector.broadcast %6 : vector<1x64xf32> to vector<256x64xf32>
    %8 = arith.addf %5, %7 : vector<256x64xf32>
    %cst_7 = arith.constant 3.000000e+00 : f32
    %9 = vector.broadcast %cst_7 : f32 to vector<256x64xf32>
    %10 = arith.addf %8, %9 : vector<256x64xf32>
    %cst_8 = arith.constant 0.000000e+00 : f32
    %cst_9 = arith.constant 6.000000e+00 : f32
    %11 = vector.broadcast %cst_8 : f32 to vector<256x64xf32>
    %12 = arith.maximumf %11, %10 : vector<256x64xf32>
    %13 = vector.broadcast %cst_9 : f32 to vector<256x64xf32>
    %14 = arith.minimumf %13, %12 : vector<256x64xf32>
    %15 = arith.mulf %8, %14 : vector<256x64xf32>
    %cst_10 = arith.constant 0.166666672 : f32
    %16 = vector.broadcast %cst_10 : f32 to vector<256x64xf32>
    %17 = arith.mulf %15, %16 : vector<256x64xf32>
    %18 = vector.shape_cast %17 : vector<256x64xf32> to vector<16x16x64xf32>
    %19 = tpu.iota {dimensions = array<i32: 1>} : vector<16x16x64xi32>
    %cst_11 = arith.constant 0.000000e+00 : f32
    %20 = vector.broadcast %cst_11 : f32 to vector<16x16x64xf32>
    %c0_i32 = arith.constant 0 : i32
    %21 = vector.broadcast %c0_i32 : i32 to vector<16x16x64xi32>
    %22 = arith.cmpi eq, %19, %21 : vector<16x16x64xi32>
    %c1_i32 = arith.constant 1 : i32
    %23 = tpu.dynamic_rotate %18 by %c1_i32 dim 1 : vector<16x16x64xf32>, i32 -> vector<16x16x64xf32>
    %24 = arith.select %22, %20, %23 : vector<16x16x64xi1>, vector<16x16x64xf32>
    %c15_i32 = arith.constant 15 : i32
    %25 = vector.broadcast %c15_i32 : i32 to vector<16x16x64xi32>
    %26 = arith.cmpi eq, %19, %25 : vector<16x16x64xi32>
    %c15_i32_12 = arith.constant 15 : i32
    %27 = tpu.dynamic_rotate %18 by %c15_i32_12 dim 1 : vector<16x16x64xf32>, i32 -> vector<16x16x64xf32>
    %28 = arith.select %26, %20, %27 : vector<16x16x64xi1>, vector<16x16x64xf32>
    %29 = tpu.concatenate %24, %18, %28 in 2 : vector<16x16x64xf32>, vector<16x16x64xf32>, vector<16x16x64xf32> -> vector<16x16x192xf32>
    %30 = arith.truncf %29 : vector<16x16x192xf32> to vector<16x16x192xbf16>
    %cst_13 = arith.constant 0.000000e+00 : bf16
    %31 = vector.broadcast %cst_13 : bf16 to vector<16x192xbf16>
    %c0_14 = arith.constant 0 : index
    %c0_15 = arith.constant 0 : index
    %c0_16 = arith.constant 0 : index
    %32 = vector.load %arg7[%c0_14, %c0_15, %c0_16] : memref<18x16x192xbf16, #tpu.memory_space<vmem>>, vector<1x16x192xbf16>
    %33 = vector.shape_cast %32 : vector<1x16x192xbf16> to vector<16x192xbf16>
    %34 = vector.shape_cast %31 : vector<16x192xbf16> to vector<1x16x192xbf16>
    tpu.vector_store %arg7[%c0_14, %c0_15, %c0_16], %34 {strides = array<i32>} : memref<18x16x192xbf16, #tpu.memory_space<vmem>>, vector<1x16x192xbf16>,
    %c17 = arith.constant 17 : index
    %c0_17 = arith.constant 0 : index
    %c0_18 = arith.constant 0 : index
    %35 = vector.load %arg7[%c17, %c0_17, %c0_18] : memref<18x16x192xbf16, #tpu.memory_space<vmem>>, vector<1x16x192xbf16>
    %36 = vector.shape_cast %35 : vector<1x16x192xbf16> to vector<16x192xbf16>
    %37 = vector.shape_cast %31 : vector<16x192xbf16> to vector<1x16x192xbf16>
    tpu.vector_store %arg7[%c17, %c0_17, %c0_18], %37 {strides = array<i32>} : memref<18x16x192xbf16, #tpu.memory_space<vmem>>, vector<1x16x192xbf16>,
    %c1 = arith.constant 1 : index
    %c0_19 = arith.constant 0 : index
    %c0_20 = arith.constant 0 : index
    %38 = vector.load %arg7[%c1, %c0_19, %c0_20] : memref<18x16x192xbf16, #tpu.memory_space<vmem>>, vector<16x16x192xbf16>
    tpu.vector_store %arg7[%c1, %c0_19, %c0_20], %30 {strides = array<i32>} : memref<18x16x192xbf16, #tpu.memory_space<vmem>>, vector<16x16x192xbf16>,
    %cst_21 = arith.constant 0.000000e+00 : f32
    %39 = vector.broadcast %cst_21 : f32 to vector<256x128xf32>
    %c0_22 = arith.constant 0 : index
    %c0_23 = arith.constant 0 : index
    %c0_24 = arith.constant 0 : index
    %40 = vector.load %arg7[%c0_22, %c0_23, %c0_24] : memref<18x16x192xbf16, #tpu.memory_space<vmem>>, vector<16x16x192xbf16>
    %41 = vector.shape_cast %40 : vector<16x16x192xbf16> to vector<256x192xbf16>
    %c0_25 = arith.constant 0 : index
    %c0_26 = arith.constant 0 : index
    %c0_27 = arith.constant 0 : index
    %42 = vector.load %arg4[%c0_25, %c0_26, %c0_27] : memref<3x192x128xbf16, #tpu.memory_space<vmem>>, vector<1x192x128xbf16>
    %43 = vector.shape_cast %42 : vector<1x192x128xbf16> to vector<192x128xbf16>
    %cst_28 = arith.constant dense<0.000000e+00> : vector<256x128xf32>
    %44 = tpu.matmul %41, %43, %cst_28 {dimension_numbers = #tpu.dot_dimension_numbers<[1], [0], [0], [1], [0, 0, 1, 1], [], []>} : vector<256x192xbf16>, vector<192x128xbf16>, vector<256x128xf32> -> vector<256x128xf32>
    %45 = arith.addf %39, %44 : vector<256x128xf32>
    %c1_29 = arith.constant 1 : index
    %c0_30 = arith.constant 0 : index
    %c0_31 = arith.constant 0 : index
    %46 = vector.load %arg7[%c1_29, %c0_30, %c0_31] : memref<18x16x192xbf16, #tpu.memory_space<vmem>>, vector<16x16x192xbf16>
    %47 = vector.shape_cast %46 : vector<16x16x192xbf16> to vector<256x192xbf16>
    %c1_32 = arith.constant 1 : index
    %c0_33 = arith.constant 0 : index
    %c0_34 = arith.constant 0 : index
    %48 = vector.load %arg4[%c1_32, %c0_33, %c0_34] : memref<3x192x128xbf16, #tpu.memory_space<vmem>>, vector<1x192x128xbf16>
    %49 = vector.shape_cast %48 : vector<1x192x128xbf16> to vector<192x128xbf16>
    %cst_35 = arith.constant dense<0.000000e+00> : vector<256x128xf32>
    %50 = tpu.matmul %47, %49, %cst_35 {dimension_numbers = #tpu.dot_dimension_numbers<[1], [0], [0], [1], [0, 0, 1, 1], [], []>} : vector<256x192xbf16>, vector<192x128xbf16>, vector<256x128xf32> -> vector<256x128xf32>
    %51 = arith.addf %45, %50 : vector<256x128xf32>
    %c2 = arith.constant 2 : index
    %c0_36 = arith.constant 0 : index
    %c0_37 = arith.constant 0 : index
    %52 = vector.load %arg7[%c2, %c0_36, %c0_37] : memref<18x16x192xbf16, #tpu.memory_space<vmem>>, vector<16x16x192xbf16>
    %53 = vector.shape_cast %52 : vector<16x16x192xbf16> to vector<256x192xbf16>
    %c2_38 = arith.constant 2 : index
    %c0_39 = arith.constant 0 : index
    %c0_40 = arith.constant 0 : index
    %54 = vector.load %arg4[%c2_38, %c0_39, %c0_40] : memref<3x192x128xbf16, #tpu.memory_space<vmem>>, vector<1x192x128xbf16>
    %55 = vector.shape_cast %54 : vector<1x192x128xbf16> to vector<192x128xbf16>
    %cst_41 = arith.constant dense<0.000000e+00> : vector<256x128xf32>
    %56 = tpu.matmul %53, %55, %cst_41 {dimension_numbers = #tpu.dot_dimension_numbers<[1], [0], [0], [1], [0, 0, 1, 1], [], []>} : vector<256x192xbf16>, vector<192x128xbf16>, vector<256x128xf32> -> vector<256x128xf32>
    %57 = arith.addf %51, %56 : vector<256x128xf32>
    %c0_42 = arith.constant 0 : index
    %c0_43 = arith.constant 0 : index
    %58 = vector.load %arg5[%c0_42, %c0_43] : memref<1x128xf32, #tpu.memory_space<vmem>>, vector<1x128xf32>
    %59 = vector.broadcast %58 : vector<1x128xf32> to vector<256x128xf32>
    %60 = arith.addf %57, %59 : vector<256x128xf32>
    %cst_44 = arith.constant 3.000000e+00 : f32
    %61 = vector.broadcast %cst_44 : f32 to vector<256x128xf32>
    %62 = arith.addf %60, %61 : vector<256x128xf32>
    %cst_45 = arith.constant 0.000000e+00 : f32
    %cst_46 = arith.constant 6.000000e+00 : f32
    %63 = vector.broadcast %cst_45 : f32 to vector<256x128xf32>
    %64 = arith.maximumf %63, %62 : vector<256x128xf32>
    %65 = vector.broadcast %cst_46 : f32 to vector<256x128xf32>
    %66 = arith.minimumf %65, %64 : vector<256x128xf32>
    %67 = arith.mulf %60, %66 : vector<256x128xf32>
    %cst_47 = arith.constant 0.166666672 : f32
    %68 = vector.broadcast %cst_47 : f32 to vector<256x128xf32>
    %69 = arith.mulf %67, %68 : vector<256x128xf32>
    %c0_48 = arith.constant 0 : index
    %c0_49 = arith.constant 0 : index
    %c0_50 = arith.constant 0 : index
    %c0_51 = arith.constant 0 : index
    %70 = vector.load %arg1[%c0_48, %c0_49, %c0_50, %c0_51] : memref<1x16x16x128xf32, #tpu.memory_space<vmem>>, vector<1x16x16x128xf32>
    %71 = vector.shape_cast %70 : vector<1x16x16x128xf32> to vector<16x16x128xf32>
    %72 = vector.shape_cast %71 : vector<16x16x128xf32> to vector<256x128xf32>
    %73 = arith.addf %69, %72 : vector<256x128xf32>
    %74 = vector.shape_cast %73 : vector<256x128xf32> to vector<16x16x128xf32>
    %c0_52 = arith.constant 0 : index
    %c0_53 = arith.constant 0 : index
    %c0_54 = arith.constant 0 : index
    %c0_55 = arith.constant 0 : index
    %75 = vector.load %arg6[%c0_52, %c0_53, %c0_54, %c0_55] : memref<1x16x16x128xf32, #tpu.memory_space<vmem>>, vector<1x16x16x128xf32>
    %76 = vector.shape_cast %75 : vector<1x16x16x128xf32> to vector<16x16x128xf32>
    %77 = vector.shape_cast %74 : vector<16x16x128xf32> to vector<1x16x16x128xf32>
    tpu.vector_store %arg6[%c0_52, %c0_53, %c0_54, %c0_55], %77 {strides = array<i32>} : memref<1x16x16x128xf32, #tpu.memory_space<vmem>>, vector<1x16x16x128xf32>,
    return
  }
  func.func @transform_0(%arg0: i32) -> (i32, i32, i32, i32) {
    %c0_i32 = arith.constant 0 : i32
    %c0_i32_0 = arith.constant 0 : i32
    %c0_i32_1 = arith.constant 0 : i32
    %c0_i32_2 = arith.constant 0 : i32
    return %arg0, %c0_i32, %c0_i32_0, %c0_i32_1 : i32, i32, i32, i32
  }
  func.func @transform_1(%arg0: i32) -> (i32, i32) {
    %c0_i32 = arith.constant 0 : i32
    %c0_i32_0 = arith.constant 0 : i32
    %c0_i32_1 = arith.constant 0 : i32
    return %c0_i32, %c0_i32_0 : i32, i32
  }
  func.func @transform_2(%arg0: i32) -> (i32, i32) {
    %c0_i32 = arith.constant 0 : i32
    %c0_i32_0 = arith.constant 0 : i32
    %c0_i32_1 = arith.constant 0 : i32
    return %c0_i32, %c0_i32_0 : i32, i32
  }
  func.func @transform_3(%arg0: i32) -> (i32, i32, i32) {
    %c0_i32 = arith.constant 0 : i32
    %c0_i32_0 = arith.constant 0 : i32
    %c0_i32_1 = arith.constant 0 : i32
    %c0_i32_2 = arith.constant 0 : i32
    return %c0_i32, %c0_i32_0, %c0_i32_1 : i32, i32, i32
  }
  func.func @transform_4(%arg0: i32) -> (i32, i32) {
    %c0_i32 = arith.constant 0 : i32
    %c0_i32_0 = arith.constant 0 : i32
    %c0_i32_1 = arith.constant 0 : i32
    return %c0_i32, %c0_i32_0 : i32, i32
  }
  func.func @transform_5(%arg0: i32) -> (i32, i32, i32, i32) {
    %c0_i32 = arith.constant 0 : i32
    %c0_i32_0 = arith.constant 0 : i32
    %c0_i32_1 = arith.constant 0 : i32
    %c0_i32_2 = arith.constant 0 : i32
    return %arg0, %c0_i32, %c0_i32_0, %c0_i32_1 : i32, i32, i32, i32
  }
}

</mosaic_0001>

<bundles_post_ra>
// kernel: tpu_custom_call.1
= control target key start
LH: loop header
LB: loop body
LE: loop exit
PB: predicated region body
PF: predicated region fallthrough
CT: control target
= control target key end

     0   :  { %10 = vsyncpa [#allocation4], 0  ;;  %s5484_s0 = inlined_call_operand.hbm [shape: f32[2,16,16,128], index: 0, kind: input, shape index: {}]   ;;  %s5485_s1 = inlined_call_operand.vmem [shape: bf16[128,64], index: 1, kind: input, shape index: {}]   ;;  %s5486_s2 = inlined_call_operand.vmem [shape: f32[1,64], index: 2, kind: input, shape index: {}]   ;;  %s5487_s3 = inlined_call_operand.hbm [shape: bf16[3,192,128], index: 3, kind: input, shape index: {}]   ;;  %s5488_s4 = inlined_call_operand.vmem [shape: f32[1,128], index: 4, kind: input, shape index: {}]   ;;  %s5489_s5 = inlined_call_operand.hbm [shape: f32[2,16,16,128], index: 5, kind: output, shape index: {}]  }
   0x1   :  { %12 = vsyncpa [#allocation4 + $0x1], 0 }
   0x2   :  { %13 = vsyncpa [#allocation7], 0 }
   0x3   :  { %14 = vsyncpa [#allocation5], 0 }
   0x4   :  { %16 = vsyncpa [#allocation5 + $0x1], 0  ;;  %s3935_s18 = smov 0   ;;  %s3937_s19 = smov 0  }
   0x5   :  { %s3939_s20 = smov 0   ;;  %s3941_s21 = smov 0  }
   0x6 LB: > { %s3956_s22 = sadd.s32 4294967295, %s3892_s21   ;;  %s3164_s23 = sadd.s32 4294967294, %s3892_s21   ;;  %s3892_s21 = sphi %s3941_s21, %s5640_s21   ;;  %s3888_s20 = sphi %s3939_s20, %s5639_s20   ;;  %s3884_s19 = sphi %s3937_s19, %s5638_s19   ;;  %s3880_s18 = sphi %s3935_s18, %s5637_s18  }
   0x7   : > { %p42_p0 = scmp.ne.s32.totalorder %s3884_s19, %s3880_s18  ;;  %p5490_p1 = scmp.eq.s32.totalorder %s3956_s22, 0 }
   0x8   : > { %p156_p3 = scmp.eq.s32.totalorder %s3164_s23, 1  ;;  %p3165_p5 = scmp.ge.s32.totalorder %s3892_s21, 1 }
   0x9   : > { %p3965_p4 = por %p5490_p1, %p42_p0  ;;  %p163_p7 = scmp.lt.s32.totalorder %s3892_s21, 3 }
   0xa   : > { %p3970_p6 = por %p156_p3, %p42_p0  ;;  %s3894_s27 = smov [#allocation6]  }
   0xb   : > { %s5504_s24 = scalar_select %p3965_p4, 1, 0 }
   0xc   : > { %s5505_s25 = scalar_select %p3970_p6, 1, 0 }
   0xd   : > { %p3975_p8 = pnand %p3165_p5, %p163_p7  ;;  %s181_s28 = sshll.u32 %s3894_s27, 4  ;;  %s182_s28 = int_to_ptr.vmem [resolvable:$true] %s181_s28 }
   0xe   : > { %s3989_s30 = sadd.s32 1, %s3892_s21   ;;  %s29_s6 = sadd.s32 1, %s3888_s20 }
   0xf   : > { %s5506_s26 = scalar_select %p3975_p8, 1, 0 }
  0x10   : > { %p3540_p9 = pneg %p3975_p8  ;;  %s26_s7 = ssub.s32 %s3892_s21, %s3989_s30 }
  0x11   : > { %s3781_s8 = scalar_lea.vmem %s182_s28, 4608  ;;  %p3789_p5 = scmp.lt.s32.totalorder %s182_s28, %s182_s28 }
  0x12   : > { %p3984_p11 = pnand %p3540_p9, %p5490_p1  ;;  %p3782_p13 = scmp.ne.s32.totalorder %s182_s28, %s3781_s8 }
  0x13   : > { %p3790_p7 = scmp.lt.s32.totalorder %s3781_s8, %s3781_s8 }
  0x14   : > { %p3772_p12 = pneg %p3984_p11 }
  0x15   : > { %p3791_p10 = por %p3790_p7, %p3789_p5 }
  0x16   : > { %p3784_p0 = pnand %p3782_p13, %p3772_p12 }
  0x18   : > { %p3785_p3 = pneg %p3784_p0 }
  0x1a   : > { %p3792_p2 = pnand %p3791_p10, %p3785_p3 }
  0x1c   : > { %3795 = shalt.err (!%p3792_p2)
}
  0x1d   : > { %s3895_s9 = smov 64   ;;  %s3896_s10 = smov 4  }
  0x1e   : > { %3543 = dma.hbm_to_vmem [thread:$0]  (!%p3984_p11), %s5487_s3, 4608, %s182_s28, [#allocation7], %s3895_s9, %s3895_s9, %s3896_s10  }
  0x1f   : > { %p27_p9 = scmp.eq.s32.totalorder %s26_s7, 0  ;;  %p36_p12 = scmp.ne.s32.totalorder %s3888_s20, %s3884_s19 }
  0x20   : > { %p37_p10 = scmp.eq.s32.totalorder %s3892_s21, 0  ;;  %p3553_p2 = scmp.lt.s32.totalorder %s3892_s21, 2 }
  0x21   : > { %s4006_s13 = scalar_select %p27_p9, %s3888_s20, %s29_s6  }
  0x22   : > { %p38_p13 = por %p37_p10, %p36_p12  ;;  %p5508_p0 = scmp.eq.s32.totalorder %s3956_s22, 1 }
  0x23   : > { %s198_s15 = sand.u32 1, %s3888_s20   ;;  %s3402_s16 = sshll.u32 %s3892_s21, 12 }
  0x24   : > { %p4010_p3 = por %p5508_p0, %p36_p12  ;;  %s3168_s17 = sshll.u32 %s198_s15, 8 }
  0x25   : > { %s4019_s29 = scalar_lea.hbm %s5484_s0, %s3402_s16  ;;  %s202_s28 = scalar_lea.vmem [#allocation3], %s3168_s17 }
  0x26   : > { %s5509_s14 = scalar_select %p4010_p3, 1, 0 }
  0x27   : > { %s209_s6 = sshll.u32 %s202_s28, 4  ;;  %p4021_p11 = pnand %p3553_p2, %p38_p13  ;;  %s4025_s6 = int_to_ptr.vmem [resolvable:$true] %s209_s6 }
  0x28   : > { %s4027_s8 = scalar_lea.sflag [#allocation4], %s198_s15  ;;  %s3796_s9 = scalar_lea.hbm %s4019_s29, 4096 }
  0x29   : > { %p3797_p5 = scmp.ne.s32.totalorder %s4019_s29, %s3796_s9  ;;  %p3798_p7 = pneg %p4021_p11 }
  0x2a   : > { %s3801_s12 = scalar_lea.hbm %s5484_s0, 8192  ;;  %p3802_p10 = scmp.lt.s32.totalorder %s4019_s29, %s5484_s0 }
  0x2b   : > { %p3799_p9 = pnand %p3798_p7, %p3797_p5  ;;  %p3803_p2 = scmp.lt.s32.totalorder %s3801_s12, %s3796_s9 }
  0x2d   : > { %p3800_p12 = pneg %p3799_p9  ;;  %p3804_p13 = por %p3803_p2, %p3802_p10 }
  0x2f   : > { %p3805_p0 = pnand %p3804_p13, %p3800_p12 }
  0x31   : > { %3808 = shalt.err (!%p3805_p0)
}
  0x32   : > { %s3809_s15 = scalar_lea.vmem %s4025_s6, 4096  ;;  %s3897_s23 = smov [#allocation3]  }
  0x33   : > { %p3810_p1 = scmp.ne.s32.totalorder %s4025_s6, %s3809_s15  ;;  %s3814_s27 = sshll.u32 %s3897_s23, 4  ;;  %s3815_s27 = int_to_ptr.vmem [resolvable:$false] %s3814_s27 }
  0x34   : > { %s3816_s28 = scalar_lea.vmem %s3815_s27, 8192  ;;  %p3817_p9 = scmp.lt.s32.totalorder %s4025_s6, %s3815_s27 }
  0x35   : > { %p3812_p6 = pnand %p3810_p1, %p3798_p7  ;;  %p3818_p3 = scmp.lt.s32.totalorder %s3816_s28, %s3809_s15 }
  0x37   : > { %p3813_p5 = pneg %p3812_p6  ;;  %p3819_p4 = por %p3818_p3, %p3817_p9 }
  0x39   : > { %p3820_p8 = pnand %p3819_p4, %p3813_p5 }
  0x3b   : > { %3823 = shalt.err (!%p3820_p8)
}
  0x3c   : > { %s3898_s9 = smov 128   ;;  %s3899_s10 = smov 8  }
  0x3d   : > { %3547 = dma.hbm_to_vmem [thread:$0]  (!%p4021_p11), %s4019_s29, 4096, %s4025_s6, %s4027_s8, %s3898_s9, %s3898_s9, %s3899_s10  }
  0x3e   : > { %p5511_p1 = scmp.ne.s32.totalorder %s5506_s26, 0 }
  0x40   : > { %221 = sbr.rel (%p5511_p1) target bundleno = 888 (0x378), region = 40 }
  0x45   : > { %s4051_s11 = sand.u32 1, %s3884_s19   ;;  %p5512_p4 = scmp.ne.s32.totalorder %s5504_s24, 0 }
  0x46   : > { %s3172_s12 = sshll.u32 %s4051_s11, 8  ;;  %s224_s16 = scalar_lea.sflag [#allocation4], %s4051_s11 }
  0x47   : > { %s4057_s17 = scalar_lea.vmem [#allocation3], %s3172_s12 }
  0x48   : > { %3867 = dma.done.wait (%p5512_p4), %s224_s16, 4096  }
  0x49   : > { %3869 = vsyncadd (%p5512_p4), %s224_s16, 4294963200  ;;  %p5513_p6 = scmp.eq.s32.totalorder %s3956_s22, 0 }
  0x4b   : > { %3871 = dma.done.wait (%p5513_p6), [#allocation7], 4608   ;;  %p5514_p8 = pmov %p5513_p6 }
  0x4c   : > { %v3677_v0 = vld [vmem:[%s5485_s1 + $0x38] sm:$0xff]   ;;  %v3678_v1 = vld [vmem:[%s5485_s1 + $0x30] sm:$0xff]   ;;  %v3679_v2 = vld [vmem:[%s5485_s1 + $0x28] sm:$0xff]   ;;  %v5494_v58 = vmov 0   ;;  %vm1093_vm0 = vcmask 1043456   ;;  %vm1094_vm1 = vcmask 523268  }
  0x4d   : > { %3873 = vsyncadd (%p5514_p8), [#allocation7], 4294962688  ;;  %3460 = vmatprep.subr.bf16.mxu0 %v3677_v0  ;;  %v3680_v3 = vld [vmem:[%s5485_s1 + $0x20] sm:$0xff]   ;;  %v260_v5 = vld [vmem:[%s4057_s17 + $0x8] sm:$0xff]  ;;  %1671 = vmatprep.subr.bf16.mxu1 %v5494_v58  ;;  %vm1028_vm4 = vcmask 523264   ;;  %s3901_s8 = smov 64  }
  0x4e   : > { %3461 = vmatpush3.bf16.msra.mxu0 %v3677_v0  ;;  %v259_v4 = vld [vmem:[%s4057_s17] sm:$0xff]  ;;  %v3681_v7 = vld [vmem:[%s5485_s1 + $0x18] sm:$0xff]   ;;  %v3682_v8 = vld [vmem:[%s5485_s1 + $0x10] sm:$0xff]   ;;  %s5318_s27 = scalar_lea.vmem [#allocation8], %s3172_s12  ;;  %s3435_s12 = sshll.u32 %s3956_s22, 12 }
  0x4f   : > { %3462 = vmatprep.subr.bf16.mxu0 %v3678_v1  ;;  %v291_v6 = vpack.c.bf16 %v260_v5, %v259_v4  ;;  %v3683_v9 = vld [vmem:[%s5485_s1 + $0x8] sm:$0xff]   ;;  %v3684_v10 = vld [vmem:[%s5485_s1] sm:$0xff]   ;;  %v261_v11 = vld [vmem:[%s4057_s17 + $0x10] sm:$0xff]  ;;  %s3081_s28 = sshll.u32 %s5318_s27, 4  ;;  %s5438_s16 = scalar_lea.hbm %s5489_s5, %s3435_s12  ;;  %s5440_s28 = int_to_ptr.vmem [resolvable:$true] %s3081_s28 }
  0x50   : > { %v262_v12 = vld [vmem:[%s4057_s17 + $0x18] sm:$0xff]  ;;  %v263_v13 = vld [vmem:[%s4057_s17 + $0x20] sm:$0xff]  ;;  %v264_v14 = vld [vmem:[%s4057_s17 + $0x28] sm:$0xff]  ;;  %s3068_s26 = scalar_lea.sflag [#allocation5], %s4051_s11  ;;  %s3824_s29 = scalar_lea.vmem %s5440_s28, 4096 }
  0x51   : > { %3476 = vmatprep.mubr.bf16.mxu0 %v291_v6  ;;  %v292_v15 = vpack.c.bf16 %v262_v12, %v261_v11  ;;  %v293_v16 = vpack.c.bf16 %v264_v14, %v263_v13  ;;  %v265_v17 = vld [vmem:[%s4057_s17 + $0x30] sm:$0xff]  ;;  %v266_v18 = vld [vmem:[%s4057_s17 + $0x38] sm:$0xff]  ;;  %v267_v19 = vld [vmem:[%s4057_s17 + $0x40] sm:$0xff]  ;;  %p3825_p3 = scmp.ne.s32.totalorder %s5440_s28, %s3824_s29  ;;  %p5634_p11 = scmp.ne.s32.totalorder %s5509_s14, 0 }
  0x52   : > { %3463 = vmatpush3.bf16.msra.mxu0 %v3678_v1  ;;  %v268_v20 = vld [vmem:[%s4057_s17 + $0x48] sm:$0xff]  ;;  %v294_v21 = vpack.c.bf16 %v266_v18, %v265_v17  ;;  %v269_v23 = vld [vmem:[%s4057_s17 + $0x50] sm:$0xff]  ;;  %v270_v24 = vld [vmem:[%s4057_s17 + $0x58] sm:$0xff]  ;;  %s3902_s22 = smov [#allocation8]  }
  0x53   : > { %3464 = vmatprep.subr.bf16.mxu0 %v3679_v2  ;;  %v295_v22 = vpack.c.bf16 %v268_v20, %v267_v19  ;;  %v271_v25 = vld [vmem:[%s4057_s17 + $0x60] sm:$0xff]  ;;  %v272_v26 = vld [vmem:[%s4057_s17 + $0x68] sm:$0xff]  ;;  %v296_v27 = vpack.c.bf16 %v270_v24, %v269_v23  ;;  %v273_v29 = vld [vmem:[%s4057_s17 + $0x70] sm:$0xff]  ;;  %p3826_p7 = pnand %p3825_p3, %p5634_p11 }
  0x54   : > { %v297_v28 = vpack.c.bf16 %v272_v26, %v271_v25  ;;  %v274_v30 = vld [vmem:[%s4057_s17 + $0x78] sm:$0xff]  ;;  %v275_v31 = vld [vmem:[%s4057_s17 + $0x80] sm:$0xff]  ;;  %v276_v32 = vld [vmem:[%s4057_s17 + $0x88] sm:$0xff] }
  0x55   : > { %v298_v33 = vpack.c.bf16 %v274_v30, %v273_v29  ;;  %v299_v34 = vpack.c.bf16 %v276_v32, %v275_v31  ;;  %v277_v35 = vld [vmem:[%s4057_s17 + $0x90] sm:$0xff]  ;;  %v278_v36 = vld [vmem:[%s4057_s17 + $0x98] sm:$0xff]  ;;  %v279_v37 = vld [vmem:[%s4057_s17 + $0xa0] sm:$0xff]  ;;  %v699_v31 = vlaneseq  ;;  %p3827_p12 = pneg %p3826_p7 }
  0x56   : > { %3465 = vmatpush3.bf16.msra.mxu0 %v3679_v2  ;;  %v280_v38 = vld [vmem:[%s4057_s17 + $0xa8] sm:$0xff]  ;;  %v300_v39 = vpack.c.bf16 %v278_v36, %v277_v35  ;;  %v281_v41 = vld [vmem:[%s4057_s17 + $0xb0] sm:$0xff]  ;;  %v282_v42 = vld [vmem:[%s4057_s17 + $0xb8] sm:$0xff] }
  0x57   : > { %3466 = vmatprep.subr.bf16.mxu0 %v3680_v3  ;;  %v301_v40 = vpack.c.bf16 %v280_v38, %v279_v37  ;;  %v283_v43 = vld [vmem:[%s4057_s17 + $0xc0] sm:$0xff]  ;;  %v284_v44 = vld [vmem:[%s4057_s17 + $0xc8] sm:$0xff]  ;;  %v302_v45 = vpack.c.bf16 %v282_v42, %v281_v41  ;;  %v285_v47 = vld [vmem:[%s4057_s17 + $0xd0] sm:$0xff] }
  0x58   : > { %v303_v46 = vpack.c.bf16 %v284_v44, %v283_v43  ;;  %v286_v48 = vld [vmem:[%s4057_s17 + $0xd8] sm:$0xff]  ;;  %v287_v49 = vld [vmem:[%s4057_s17 + $0xe0] sm:$0xff]  ;;  %v288_v50 = vld [vmem:[%s4057_s17 + $0xe8] sm:$0xff]  ;;  %v4176_v43 = vshrl.u32 %v699_v31, 7 }
  0x59   : > { %v304_v51 = vpack.c.bf16 %v286_v48, %v285_v47  ;;  %v305_v52 = vpack.c.bf16 %v288_v50, %v287_v49  ;;  %v289_v53 = vld [vmem:[%s4057_s17 + $0xf0] sm:$0xff]  ;;  %v290_v54 = vld [vmem:[%s4057_s17 + $0xf8] sm:$0xff]  ;;  %v3688_v61 = vld [vmem:[#allocation6 + $0x28] sm:$0xff]  }
  0x5a   : > { %3467 = vmatpush3.bf16.msra.mxu0 %v3680_v3  ;;  %v306_v55 = vpack.c.bf16 %v290_v54, %v289_v53  ;;  %v3685_v56 = vld [vmem:[#allocation6 + $0x38] sm:$0xff]   ;;  %v3686_v59 = vld [vmem:[#allocation6 + $0x30] sm:$0xff]   ;;  %v3691_v62 = vld [vmem:[#allocation6 + $0x88] sm:$0xff]   ;;  %vm736_vm3 = vcmp.lt.s32.totalorder %v4176_v43, 1  ;;  %vm835_vm5 = vcmp.lt.s32.totalorder %v4176_v43, 7  ;;  %vm702_vm6 = vcmp.eq.s32.totalorder %v4176_v43, 0 }
  0x5b   : > { %3468 = vmatprep.subr.bf16.mxu0 %v3681_v7  ;;  %v3687_v57 = vld [vmem:[#allocation6 + $0x98] sm:$0xff]   ;;  %v3689_v60 = vld [vmem:[#allocation6 + $0x90] sm:$0xff]   ;;  %vm4127_vm2 = vmor %vm1094_vm1, %vm1093_vm0 }
  0x5c   : > { %1672 = vmatpush1.bf16.msra.mxu1 %v3687_v57  ;;  %1096 = vst.msk [vmem:[#allocation2] sm:$0xff] %vm4127_vm2, %v5494_v58  ;;  %1097 = vst.msk [vmem:[#allocation2 + $0x8] sm:$0xff] %vm4127_vm2, %v5494_v58  ;;  %v3690_v0 = vld [vmem:[#allocation6 + $0x20] sm:$0xff]   ;;  %v3692_v2 = vld [vmem:[#allocation6 + $0x18] sm:$0xff]  }
  0x5d   : > { %1673 = vmatprep.subr.bf16.mxu1 %v5494_v58  ;;  %1099 = vst.msk [vmem:[#allocation2 + $0x110] sm:$0xff] %vm4127_vm2, %v5494_v58  ;;  %1100 = vst.msk [vmem:[#allocation2 + $0x118] sm:$0xff] %vm4127_vm2, %v5494_v58  ;;  %v3693_v1 = vld [vmem:[#allocation6 + $0x80] sm:$0xff]   ;;  %v3695_v3 = vld [vmem:[#allocation6 + $0x78] sm:$0xff]  }
  0x5e   : > { %3469 = vmatpush3.bf16.msra.mxu0 %v3681_v7  ;;  %v3694_v4 = vld [vmem:[#allocation6 + $0x10] sm:$0xff]   ;;  %v3696_v6 = vld [vmem:[#allocation6 + $0x8] sm:$0xff]   ;;  %v4162_v13 = vld [vmem:[%s5486_s2] ss:$0 sm:$0xff] }
  0x5f   : > { %3470 = vmatprep.subr.bf16.mxu0 %v3682_v8  ;;  %v3697_v5 = vld [vmem:[#allocation6 + $0x70] sm:$0xff]   ;;  %v3699_v7 = vld [vmem:[#allocation6 + $0x68] sm:$0xff]  }
  0x60   : > { %1674 = vmatpush1.bf16.msra.mxu1 %v3689_v60  ;;  %v3702_v11 = vld [vmem:[#allocation6 + $0x50] sm:$0xff]   ;;  %v3704_v57 = vld [vmem:[#allocation6 + $0x48] sm:$0xff]  }
  0x61   : > { %1675 = vmatprep.subr.bf16.mxu1 %v5494_v58 }
  0x62   : > { %3471 = vmatpush3.bf16.msra.mxu0 %v3682_v8  ;;  %v3698_v8 = vld [vmem:[#allocation6] sm:$0xff]  }
  0x63   : > { %3472 = vmatprep.subr.bf16.mxu0 %v3683_v9 }
  0x64   : > { %1676 = vmatpush1.bf16.msra.mxu1 %v3691_v62 }
  0x65   : > { %1677 = vmatprep.subr.bf16.mxu1 %v5494_v58 }
  0x66   : > { %3473 = vmatpush3.bf16.msra.mxu0 %v3683_v9  ;;  %v3701_v9 = vld [vmem:[#allocation6 + $0x60] sm:$0xff]  }
  0x67   : > { %3474 = vmatprep.subr.bf16.mxu0 %v3684_v10 }
  0x68   : > { %1678 = vmatpush1.bf16.msra.mxu1 %v3693_v1 }
  0x69   : > { %1679 = vmatprep.subr.bf16.mxu1 %v5494_v58 }
  0x6a   : > { %3475 = vmatpush3.bf16.msra.mxu0 %v3684_v10  ;;  %v3700_v10 = vld [vmem:[#allocation6 + $0x58] sm:$0xff]  }
  0x6b   : > { %2096 = vmatprep.subr.bf16.mxu0 %v5494_v58 }
  0x6c   : > { %1680 = vmatpush1.bf16.msra.mxu1 %v3695_v3 }
  0x6d   : > { %3477 = vmatmul.mubr.bf16.vlgmr.msra.gmra.mxu0 %v292_v15  ;;  %1681 = vmatprep.subr.bf16.mxu1 %v5494_v58 }
  0x6e   : > { %3480 = vmatprep.mubr.bf16.mxu0 %v293_v16  ;;  %2097 = vmatpush1.bf16.msra.mxu0 %v3685_v56  ;;  %v3703_v56 = vld [vmem:[#allocation6 + $0xb8] sm:$0xff]  }
  0x6f   : > { %2098 = vmatprep.subr.bf16.mxu0 %v5494_v58 }
  0x70   : > { %1682 = vmatpush1.bf16.msra.mxu1 %v3697_v5 }
  0x71   : > { %1683 = vmatprep.subr.bf16.mxu1 %v5494_v58 }
  0x72   : > { %2099 = vmatpush1.bf16.msra.mxu0 %v3686_v59 }
  0x73   : > { %2100 = vmatprep.subr.bf16.mxu0 %v5494_v58 }
  0x74   : > { %1684 = vmatpush1.bf16.msra.mxu1 %v3699_v7 }
  0x75   : > { %3481 = vmatmul.mubr.bf16.gmra.mxu0 %v294_v21  ;;  %1685 = vmatprep.subr.bf16.mxu1 %v5494_v58 }
  0x76   : > { %3484 = vmatprep.mubr.bf16.mxu0 %v295_v22  ;;  %2101 = vmatpush1.bf16.msra.mxu0 %v3688_v61 }
  0x77   : > { %2102 = vmatprep.subr.bf16.mxu0 %v5494_v58 }
  0x78   : > { %1686 = vmatpush1.bf16.msra.mxu1 %v3701_v9 }
  0x79   : > { %1695 = vmatprep.subr.bf16.mxu1 %v5494_v58 }
  0x7a   : > { %2103 = vmatpush1.bf16.msra.mxu0 %v3690_v0 }
  0x7b   : > { %2104 = vmatprep.subr.bf16.mxu0 %v5494_v58 }
  0x7c   : > { %1696 = vmatpush2.bf16.msra.mxu1 %v3703_v56 }
  0x7d   : > { %3485 = vmatmul.mubr.bf16.gmra.mxu0 %v296_v27  ;;  %1697 = vmatprep.subr.bf16.mxu1 %v5494_v58 }
  0x7e   : > { %3488 = vmatprep.mubr.bf16.mxu0 %v297_v28  ;;  %2105 = vmatpush1.bf16.msra.mxu0 %v3692_v2 }
  0x7f   : > { %2106 = vmatprep.subr.bf16.mxu0 %v5494_v58 }
  0x82   : > { %2107 = vmatpush1.bf16.msra.mxu0 %v3694_v4 }
  0x83   : > { %2108 = vmatprep.subr.bf16.mxu0 %v5494_v58 }
  0x85   : > { %3489 = vmatmul.mubr.bf16.gmra.mxu0 %v298_v33 }
  0x86   : > { %3492 = vmatprep.mubr.bf16.mxu0 %v299_v34  ;;  %2109 = vmatpush1.bf16.msra.mxu0 %v3696_v6 }
  0x87   : > { %2110 = vmatprep.subr.bf16.mxu0 %v5494_v58 }
  0x8a   : > { %2111 = vmatpush1.bf16.msra.mxu0 %v3698_v8 }
  0x8b   : > { %2120 = vmatprep.subr.bf16.mxu0 %v5494_v58 }
  0x8d   : > { %3493 = vmatmul.mubr.bf16.gmra.mxu0 %v300_v39 }
  0x8e   : > { %3496 = vmatprep.mubr.bf16.mxu0 %v301_v40  ;;  %2121 = vmatpush2.bf16.msra.mxu0 %v3700_v10 }
  0x8f   : > { %2122 = vmatprep.subr.bf16.mxu0 %v5494_v58 }
  0x92   : > { %2123 = vmatpush2.bf16.msra.mxu0 %v3702_v11  ;;  %v3705_v11 = vld [vmem:[#allocation6 + $0xb0] sm:$0xff]  }
  0x93   : > { %2124 = vmatprep.subr.bf16.mxu0 %v5494_v58  ;;  %1698 = vmatpush2.bf16.msra.mxu1 %v3705_v11 }
  0x94   : > { %1699 = vmatprep.subr.bf16.mxu1 %v5494_v58 }
  0x95   : > { %3497 = vmatmul.mubr.bf16.gmra.mxu0 %v302_v45 }
  0x96   : > { %3500 = vmatprep.mubr.bf16.mxu0 %v303_v46  ;;  %2125 = vmatpush2.bf16.msra.mxu0 %v3704_v57 }
  0x97   : > { %2126 = vmatprep.subr.bf16.mxu0 %v5494_v58 }
  0x9d   : > { %3501 = vmatmul.mubr.bf16.gmra.mxu0 %v304_v51 }
  0x9e   : > { %3504 = vmatprep.mubr.bf16.mxu0 %v305_v52 }
  0xa5   : > { %3505 = vmatmul.mubr.bf16.gmra.mxu0 %v306_v55 }
 0x12d   : > { %v3478_v12 = vpop.f32.mrf.mxu0 }
 0x12e   : > { %v421_v16 = vadd.f32 %v3478_v12, %v4162_v13  ;;  %v3706_v12 = vld [vmem:[#allocation6 + $0x40] sm:$0xff]  }
 0x12f   : > { %v412_v14 = vpop.f32.mrf.mxu0  ;;  %2127 = vmatpush2.bf16.msra.mxu0 %v3706_v12 }
 0x130   : > { %v413_v15 = vadd.f32 %v4162_v13, %v412_v14  ;;  %v541_v24 = vadd.f32 3.0, %v421_v16  ;;  %2579 = vmatprep.subr.bf16.mxu0 %v5494_v58 }
 0x131   : > { %v3479_v17 = vpop.f32.mrf.mxu0 }
 0x132   : > { %v539_v18 = vadd.f32 3.0, %v413_v15  ;;  %v424_v19 = vadd.f32 %v3479_v17, %v4162_v13  ;;  %v573_v32 = vmax.f32 %v541_v24, 0.0  ;;  %v3707_v17 = vld [vmem:[#allocation2] ss:$8 sps:$4 sm:$0xff]  }
 0x133   : > { %v415_v20 = vpop.f32.mrf.mxu0  ;;  %v3710_v24 = vld [vmem:[#allocation6 + $0xa8] sm:$0xff]  }
 0x134   : > { %v571_v21 = vmax.f32 %v539_v18, 0.0  ;;  %v542_v22 = vadd.f32 3.0, %v424_v19  ;;  %v416_v23 = vadd.f32 %v4162_v13, %v415_v20  ;;  %v605_v44 = vmin.f32 %v573_v32, 6.0  ;;  %v3709_v18 = vld [vmem:[#allocation2 + $0x4] ss:$8 sps:$4 sm:$0xff]   ;;  %1700 = vmatpush2.bf16.msra.mxu1 %v3710_v24 }
 0x135   : > { %v3482_v25 = vpop.f32.mrf.mxu0  ;;  %3320 = vmatprep.mubr.msk.bf16.mxu0 %vm1028_vm4, %v3709_v18  ;;  %1701 = vmatprep.subr.bf16.mxu1 %v5494_v58 }
 0x136   : > { %v603_v26 = vmin.f32 %v571_v21, 6.0  ;;  %v540_v27 = vadd.f32 3.0, %v416_v23  ;;  %v574_v28 = vmax.f32 %v542_v22, 0.0  ;;  %v4170_v36 = vadd.f32 %v3482_v25, %v4162_v13  ;;  %2129 = vmatmul.mubr.bf16.vlgmr.msra.gmra.mxu0 %v3707_v17 }
 0x137   : > { %v428_v29 = vpop.f32.mrf.mxu0  ;;  %v637_v0 = vmul.f32 %v605_v44, %v421_v16 }
 0x138   : > { %v572_v30 = vmax.f32 %v540_v27, 0.0  ;;  %v429_v33 = vadd.f32 %v4162_v13, %v428_v29  ;;  %v635_v35 = vmul.f32 %v603_v26, %v413_v15  ;;  %v606_v37 = vmin.f32 %v574_v28, 6.0 }
 0x139   : > { %v3483_v34 = vpop.f32.mrf.mxu0  ;;  %v545_v49 = vadd.f32 3.0, %v4170_v36  ;;  %v4202_v25 = vmul.f32 0.16666667, %v637_v0 }
 0x13a   : > { %v604_v38 = vmin.f32 %v572_v30, 6.0  ;;  %v543_v39 = vadd.f32 3.0, %v429_v33  ;;  %v4173_v40 = vadd.f32 %v3483_v34, %v4162_v13  ;;  %v4183_v52 = vmul.f32 0.16666667, %v635_v35 }
 0x13b   : > { %v431_v41 = vpop.f32.mrf.mxu0  ;;  %v638_v53 = vmul.f32 %v606_v37, %v424_v19  ;;  %v577_v3 = vmax.f32 %v545_v49, 0.0 }
 0x13c   : > { %v432_v42 = vadd.f32 %v4162_v13, %v431_v41  ;;  %v636_v45 = vmul.f32 %v604_v38, %v416_v23  ;;  %v575_v46 = vmax.f32 %v543_v39, 0.0  ;;  %v546_v47 = vadd.f32 3.0, %v4173_v40 }
 0x13d   : > { %v3486_v48 = vpop.f32.mrf.mxu0  ;;  %v704_v7 = vrot.slane %v4183_v52, 7  ;;  %v4198_v14 = vmul.f32 0.16666667, %v638_v53  ;;  %v609_v26 = vmin.f32 %v577_v3, 6.0 }
 0x13e   : > { %v544_v50 = vadd.f32 3.0, %v432_v42  ;;  %v4181_v51 = vadd.f32 %v3486_v48, %v4162_v13  ;;  %v4185_v54 = vmul.f32 0.16666667, %v636_v45  ;;  %v607_v59 = vmin.f32 %v575_v46, 6.0 }
 0x13f   : > { %v444_v55 = vpop.f32.mrf.mxu0  ;;  %v578_v1 = vmax.f32 %v546_v47, 0.0  ;;  %v3602_v35 = vpack.i.bf16 %v4198_v14, %v4202_v25  ;;  %v641_v48 = vmul.f32 %v609_v26, %v4170_v36 }
 0x140   : > { %v576_v60 = vmax.f32 %v544_v50, 0.0  ;;  %v549_v61 = vadd.f32 3.0, %v4181_v51  ;;  %v4189_v62 = vadd.f32 %v4162_v13, %v444_v55  ;;  %v720_v8 = vrot.slane %v4185_v54, 7  ;;  %v3711_v50 = vld [vmem:[#allocation6 + $0xa0] sm:$0xff]  }
 0x141   : > { %v3487_v2 = vpop.f32.mrf.mxu0  ;;  %v639_v15 = vmul.f32 %v607_v59, %v429_v33  ;;  %v610_v19 = vmin.f32 %v578_v1, 6.0  ;;  %v3597_v22 = vpack.i.bf16 %v4185_v54, %v4183_v52  ;;  %1702 = vmatpush2.bf16.msra.mxu1 %v3711_v50  ;;  %v803_v50 = vrot.slane %v4183_v52, 1 }
 0x142   : > { %v608_v4 = vmin.f32 %v576_v60, 6.0  ;;  %v581_v5 = vmax.f32 %v549_v61, 0.0  ;;  %v547_v6 = vadd.f32 3.0, %v4189_v62  ;;  %v456_v9 = vadd.f32 %v3487_v2, %v4162_v13  ;;  %3508 = vmatprep.subr.bf16.mxu1 %v5494_v58 }
 0x143   : > { %v447_v10 = vpop.f32.mrf.mxu0  ;;  %3598 = vrot.lane.b32.xlu0 %v3597_v22, %s3901_s8  ;;  %v4217_v33 = vsel %vm736_vm3, %v704_v7, %v720_v8  ;;  %v4220_v34 = vmul.f32 0.16666667, %v639_v15  ;;  %v642_v37 = vmul.f32 %v610_v19, %v4173_v40 }
 0x144   : > { %v640_v16 = vmul.f32 %v608_v4, %v432_v42  ;;  %v579_v20 = vmax.f32 %v547_v6, 0.0  ;;  %v550_v21 = vadd.f32 3.0, %v456_v9  ;;  %v613_v28 = vmin.f32 %v581_v5, 6.0 }
 0x145   : > { %v3490_v23 = vpop.f32.mrf.mxu0  ;;  %v448_v30 = vadd.f32 %v4162_v13, %v447_v10  ;;  %v4234_v59 = vmul.f32 0.16666667, %v642_v37  ;;  %v4239_v4 = vmul.f32 0.16666667, %v641_v48 }
 0x146   : > { %v4204_v27 = vmul.f32 0.16666667, %v640_v16  ;;  %v582_v29 = vmax.f32 %v550_v21, 0.0  ;;  %v469_v31 = vadd.f32 %v3490_v23, %v4162_v13  ;;  %v611_v38 = vmin.f32 %v579_v20, 6.0  ;;  %v4244_v16 = vld [vmem:[#allocation6 + $0xf8] sm:$0xff]  }
 0x147   : > { %v460_v32 = vpop.f32.mrf.mxu0  ;;  %v548_v41 = vadd.f32 3.0, %v448_v30  ;;  %v645_v49 = vmul.f32 %v613_v28, %v4181_v51  ;;  %3603 = vrot.lane.b32.xlu0 %v3602_v35, %s3901_s8  ;;  %v3612_v19 = vpack.i.bf16 %v4234_v59, %v4239_v4  ;;  %2580 = vmatpush1.bf16.msra.mxu0 %v4244_v16 }
 0x148   : > { %v614_v39 = vmin.f32 %v582_v29, 6.0  ;;  %v553_v44 = vadd.f32 3.0, %v469_v31  ;;  %v461_v45 = vadd.f32 %v4162_v13, %v460_v32  ;;  %v3607_v47 = vpack.i.bf16 %v4204_v27, %v4220_v34  ;;  %2581 = vmatprep.subr.bf16.mxu0 %v5494_v58 }
 0x149   : > { %v3491_v42 = vpop.f32.mrf.mxu0  ;;  %v580_v53 = vmax.f32 %v548_v41, 0.0  ;;  %v643_v60 = vmul.f32 %v611_v38, %v4189_v62  ;;  %v4241_v5 = vmul.f32 0.16666667, %v645_v49  ;;  %v705_v49 = vrot.slane %v4202_v25, 7 }
 0x14a   : > { %v472_v46 = vadd.f32 %v3491_v42, %v4162_v13  ;;  %v585_v55 = vmax.f32 %v553_v44, 0.0  ;;  %v551_v56 = vadd.f32 3.0, %v461_v45  ;;  %3608 = vrot.lane.b32.xlu1 %v3607_v47, %s3901_s8  ;;  %v646_v61 = vmul.f32 %v614_v39, %v456_v9 }
 0x14b   : > { %v463_v40 = vpop.f32.mrf.mxu0  ;;  %v612_v51 = vmin.f32 %v580_v53, 6.0  ;;  %v4251_v22 = vmul.f32 0.16666667, %v643_v60 }
 0x14c   : > { %v554_v57 = vadd.f32 3.0, %v472_v46  ;;  %v464_v0 = vadd.f32 %v4162_v13, %v463_v40  ;;  %v617_v1 = vmin.f32 %v585_v55, 6.0  ;;  %v583_v2 = vmax.f32 %v551_v56, 0.0 }
 0x14d   : > { %v3494_v36 = vpop.f32.mrf.mxu0  ;;  %v644_v62 = vmul.f32 %v612_v51, %v448_v30  ;;  %v4253_v23 = vmul.f32 0.16666667, %v646_v61  ;;  %v820_v55 = vrot.slane %v4198_v14, 1  ;;  %v819_v56 = vrot.slane %v4185_v54, 1  ;;  %v4279_v61 = vld [vmem:[#allocation6 + $0xf0] sm:$0xff]  }
 0x14e   : > { %v586_v3 = vmax.f32 %v554_v57, 0.0  ;;  %v552_v6 = vadd.f32 3.0, %v464_v0  ;;  %v485_v10 = vadd.f32 %v3494_v36, %v4162_v13  ;;  %v649_v9 = vmul.f32 %v617_v1, %v469_v31  ;;  %3613 = vrot.lane.b32.xlu1 %v3612_v19, %s3901_s8  ;;  %5517 = vst [vmem:[#allocation12_spill] sm:$0xff] %v4279_v61  ;;  %2582 = vmatpush1.bf16.msra.mxu0 %v4279_v61 }
 0x14f   : > { %v476_v11 = vpop.f32.mrf.mxu0  ;;  %v615_v12 = vmin.f32 %v583_v2, 6.0  ;;  %v4255_v24 = vmul.f32 0.16666667, %v644_v62  ;;  %v3622_v47 = vpack.i.bf16 %v4253_v23, %v4241_v5  ;;  %2583 = vmatprep.subr.bf16.mxu0 %v5494_v58  ;;  %v5521_v54 = vrot.slane %v4202_v25, 1 }
 0x150   : > { %v618_v15 = vmin.f32 %v586_v3, 6.0  ;;  %v584_v17 = vmax.f32 %v552_v6, 0.0  ;;  %v557_v18 = vadd.f32 3.0, %v485_v10  ;;  %v4249_v20 = vadd.f32 %v4162_v13, %v476_v11 }
 0x151   : > { %v3495_v21 = vpop.f32.mrf.mxu0  ;;  %v4262_v35 = vmul.f32 0.16666667, %v649_v9  ;;  %v647_v37 = vmul.f32 %v615_v12, %v461_v45  ;;  %v3617_v48 = vpack.i.bf16 %v4255_v24, %v4251_v22  ;;  %v721_v45 = vrot.slane %v4198_v14, 7 }
 0x152   : > { %v650_v26 = vmul.f32 %v618_v15, %v472_v46  ;;  %v616_v28 = vmin.f32 %v584_v17, 6.0  ;;  %v589_v29 = vmax.f32 %v557_v18, 0.0  ;;  %v555_v30 = vadd.f32 3.0, %v4249_v20  ;;  %3623 = vrot.lane.b32.xlu1 %v3622_v47, %s3901_s8 }
 0x153   : > { %v488_v31 = vadd.f32 %v3495_v21, %v4162_v13  ;;  %v479_v32 = vpop.f32.mrf.mxu0  ;;  %3618 = vrot.lane.b32.xlu0 %v3617_v48, %s3901_s8  ;;  %v4286_v3 = vmul.f32 0.16666667, %v647_v37  ;;  %v4429_v52 = vsel %vm736_vm3, %v721_v45, %v705_v49 }
 0x154   : > { %v4264_v38 = vmul.f32 0.16666667, %v650_v26  ;;  %v648_v39 = vmul.f32 %v616_v28, %v464_v0  ;;  %v621_v41 = vmin.f32 %v589_v29, 6.0  ;;  %v587_v44 = vmax.f32 %v555_v30, 0.0 }
 0x155   : > { %v3498_v42 = vpop.f32.mrf.mxu0  ;;  %v558_v46 = vadd.f32 3.0, %v488_v31  ;;  %v480_v0 = vadd.f32 %v4162_v13, %v479_v32 }
 0x156   : > { %v501_v36 = vadd.f32 %v3498_v42, %v4162_v13  ;;  %v3632_v1 = vpack.i.bf16 %v4264_v38, %v4262_v35  ;;  %v4288_v6 = vmul.f32 0.16666667, %v648_v39  ;;  %v653_v11 = vmul.f32 %v621_v41, %v485_v10 }
 0x157   : > { %v492_v53 = vpop.f32.mrf.mxu0  ;;  %v590_v60 = vmax.f32 %v558_v46, 0.0  ;;  %v619_v62 = vmin.f32 %v587_v44, 6.0  ;;  %v556_v12 = vadd.f32 3.0, %v480_v0 }
 0x158   : > { %v493_v51 = vadd.f32 %v4162_v13, %v492_v53  ;;  %v561_v15 = vadd.f32 3.0, %v501_v36  ;;  %3633 = vrot.lane.b32.xlu1 %v3632_v1, %s3901_s8  ;;  %v4298_v41 = vmul.f32 0.16666667, %v653_v11  ;;  %v3627_v44 = vpack.i.bf16 %v4288_v6, %v4286_v3 }
 0x159   : > { %v3499_v2 = vpop.f32.mrf.mxu0  ;;  %v622_v9 = vmin.f32 %v590_v60, 6.0  ;;  %v588_v29 = vmax.f32 %v556_v12, 0.0  ;;  %v651_v46 = vmul.f32 %v619_v62, %v4249_v20 }
 0x15a   : > { %v559_v17 = vadd.f32 3.0, %v493_v51  ;;  %v504_v10 = vadd.f32 %v3499_v2, %v4162_v13  ;;  %v593_v30 = vmax.f32 %v561_v15, 0.0  ;;  %3628 = vrot.lane.b32.xlu0 %v3627_v44, %s3901_s8 }
 0x15b   : > { %v495_v18 = vpop.f32.mrf.mxu0  ;;  %v654_v28 = vmul.f32 %v622_v9, %v488_v31  ;;  %v620_v48 = vmin.f32 %v588_v29, 6.0 }
 0x15c   : > { %v591_v32 = vmax.f32 %v559_v17, 0.0  ;;  %v562_v42 = vadd.f32 3.0, %v504_v10  ;;  %v625_v53 = vmin.f32 %v593_v30, 6.0  ;;  %v496_v1 = vadd.f32 %v4162_v13, %v495_v18 }
 0x15d   : > { %v3502_v37 = vpop.f32.mrf.mxu0  ;;  %v4303_v47 = vmul.f32 0.16666667, %v654_v28  ;;  %v652_v15 = vmul.f32 %v620_v48, %v480_v0 }
 0x15e   : > { %v594_v31 = vmax.f32 %v562_v42, 0.0  ;;  %v517_v2 = vadd.f32 %v3502_v37, %v4162_v13  ;;  %v623_v20 = vmin.f32 %v591_v32, 6.0  ;;  %v657_v17 = vmul.f32 %v625_v53, %v501_v36  ;;  %v4318_v32 = vld [vmem:[#allocation6 + $0xe8] sm:$0xff]  }
 0x15f   : > { %v508_v60 = vpop.f32.mrf.mxu0  ;;  %v560_v29 = vadd.f32 3.0, %v496_v1  ;;  %v4311_v42 = vmul.f32 0.16666667, %v651_v46  ;;  %v4313_v44 = vmul.f32 0.16666667, %v652_v15  ;;  %v3642_v37 = vpack.i.bf16 %v4303_v47, %v4298_v41  ;;  %5518 = vst [vmem:[#allocation13_spill] sm:$0xff] %v4318_v32  ;;  %2584 = vmatpush1.bf16.msra.mxu0 %v4318_v32 }
 0x160   : > { %v509_v11 = vadd.f32 %v4162_v13, %v508_v60  ;;  %v626_v28 = vmin.f32 %v594_v31, 6.0  ;;  %v565_v30 = vadd.f32 3.0, %v517_v2  ;;  %v655_v53 = vmul.f32 %v623_v20, %v493_v51  ;;  %2585 = vmatprep.subr.bf16.mxu0 %v5494_v58 }
 0x161   : > { %v3503_v62 = vpop.f32.mrf.mxu0  ;;  %v592_v57 = vmax.f32 %v560_v29, 0.0  ;;  %3643 = vrot.lane.b32.xlu1 %v3642_v37, %s3901_s8  ;;  %v4325_v39 = vmul.f32 0.16666667, %v657_v17  ;;  %v3637_v46 = vpack.i.bf16 %v4313_v44, %v4311_v42 }
 0x162   : > { %v563_v18 = vadd.f32 3.0, %v509_v11  ;;  %v658_v9 = vmul.f32 %v626_v28, %v504_v10  ;;  %v597_v0 = vmax.f32 %v565_v30, 0.0  ;;  %v520_v30 = vadd.f32 %v3503_v62, %v4162_v13 }
 0x163   : > { %v511_v60 = vpop.f32.mrf.mxu0  ;;  %v624_v10 = vmin.f32 %v592_v57, 6.0  ;;  %v4338_v57 = vmul.f32 0.16666667, %v655_v53  ;;  %3638 = vrot.lane.b32.xlu0 %v3637_v46, %s3901_s8 }
 0x164   : > { %v4327_v26 = vmul.f32 0.16666667, %v658_v9  ;;  %v629_v28 = vmin.f32 %v597_v0, 6.0  ;;  %v595_v29 = vmax.f32 %v563_v18, 0.0  ;;  %v512_v9 = vadd.f32 %v4162_v13, %v511_v60 }
 0x165   : > { %v3506_v31 = vpop.f32.mrf.mxu0  ;;  %v656_v37 = vmul.f32 %v624_v10, %v496_v1  ;;  %v566_v0 = vadd.f32 3.0, %v520_v30 }
 0x166   : > { %v627_v18 = vmin.f32 %v595_v29, 6.0  ;;  %v533_v62 = vadd.f32 %v3506_v31, %v4162_v13  ;;  %v661_v15 = vmul.f32 %v629_v28, %v517_v2  ;;  %v564_v48 = vadd.f32 3.0, %v512_v9  ;;  %v4360_v2 = vld [vmem:[#allocation6 + $0xe0] sm:$0xff]  }
 0x167   : > { %v524_v51 = vpop.f32.mrf.mxu0  ;;  %v3652_v17 = vpack.i.bf16 %v4327_v26, %v4325_v39  ;;  %v4345_v10 = vmul.f32 0.16666667, %v656_v37  ;;  %v598_v20 = vmax.f32 %v566_v0, 0.0  ;;  %5519 = vst [vmem:[#allocation14_spill] sm:$0xff] %v4360_v2  ;;  %2586 = vmatpush1.bf16.msra.mxu0 %v4360_v2 }
 0x168   : > { %v525_v36 = vadd.f32 %v4162_v13, %v524_v51  ;;  %v659_v60 = vmul.f32 %v627_v18, %v509_v11  ;;  %v569_v53 = vadd.f32 3.0, %v533_v62  ;;  %v596_v46 = vmax.f32 %v564_v48, 0.0  ;;  %2587 = vmatprep.subr.bf16.mxu0 %v5494_v58 }
 0x169   : > { %v3507_v1 = vpop.f32.mrf.mxu0  ;;  %3653 = vrot.lane.b32.xlu1 %v3652_v17, %s3901_s8  ;;  %v630_v51 = vmin.f32 %v598_v20, 6.0  ;;  %v4354_v29 = vmul.f32 0.16666667, %v661_v15  ;;  %v3647_v17 = vpack.i.bf16 %v4345_v10, %v4338_v57  ;;  %v4372_v15 = vsel %vm736_vm3, %v720_v8, %v704_v7 }
 0x16a   : > { %v567_v21 = vadd.f32 3.0, %v525_v36  ;;  %v628_v37 = vmin.f32 %v596_v46, 6.0  ;;  %v601_v12 = vmax.f32 %v569_v53, 0.0  ;;  %v536_v18 = vadd.f32 %v3507_v1, %v4162_v13 }
 0x16b   : > { %v527_v0 = vpop.f32.mrf.mxu0  ;;  %v4356_v19 = vmul.f32 0.16666667, %v659_v60  ;;  %v662_v48 = vmul.f32 %v630_v51, %v520_v30  ;;  %3648 = vrot.lane.b32.xlu0 %v3647_v17, %s3901_s8  ;;  %v731_v17 = vrot.slane %v4327_v26, 7 }
 0x16c   : > { %v599_v11 = vmax.f32 %v567_v21, 0.0  ;;  %v660_v31 = vmul.f32 %v628_v37, %v512_v9  ;;  %v633_v40 = vmin.f32 %v601_v12, 6.0  ;;  %v570_v20 = vadd.f32 3.0, %v536_v18 }
 0x16d   : > { %v4362_v46 = vmul.f32 0.16666667, %v662_v48  ;;  %v528_v21 = vadd.f32 %v4162_v13, %v527_v0  ;;  %v4380_v12 = vsel %vm835_vm5, %v803_v50, %v819_v56  ;;  %v5541_v13 = vrot.slane %v4241_v5, 7 }
 0x16e   : > { %v631_v28 = vmin.f32 %v599_v11, 6.0  ;;  %v4384_v30 = vmul.f32 0.16666667, %v660_v31  ;;  %v665_v9 = vmul.f32 %v633_v40, %v533_v62  ;;  %v602_v1 = vmax.f32 %v570_v20, 0.0 }
 0x16f   : > { %v568_v60 = vadd.f32 3.0, %v528_v21  ;;  %v3662_v53 = vpack.i.bf16 %v4362_v46, %v4354_v29  ;;  %v830_v31 = vrot.slane %v4327_v26, 1  ;;  %v5542_v7 = vmov %v5541_v13 }
 0x170   : > { %v663_v40 = vmul.f32 %v631_v28, %v525_v36  ;;  %v634_v62 = vmin.f32 %v602_v1, 6.0  ;;  %v3657_v48 = vpack.i.bf16 %v4384_v30, %v4356_v19  ;;  %v4401_v51 = vmul.f32 0.16666667, %v665_v9 }
 0x171   : > { %v600_v0 = vmax.f32 %v568_v60, 0.0  ;;  %3663 = vrot.lane.b32.xlu1 %v3662_v53, %s3901_s8  ;;  %v4410_v36 = vsel %vm835_vm5, %v819_v56, %v803_v50  ;;  %v4418_v28 = vsel %vm736_vm3, %v705_v49, %v721_v45  ;;  %v4437_v50 = vsel %vm835_vm5, %v5521_v54, %v820_v55 }
 0x172   : > { %v666_v37 = vmul.f32 %v634_v62, %v536_v18  ;;  %3658 = vrot.lane.b32.xlu0 %v3657_v48, %s3901_s8  ;;  %v4420_v18 = vld [vmem:[#allocation6 + $0xd8] sm:$0xff]   ;;  %v5522_v56 = vmov %v5521_v54  ;;  %v728_v60 = vrot.slane %v4313_v44, 7  ;;  %v4448_v49 = vmul.f32 0.16666667, %v663_v40 }
 0x173   : > { %v632_v11 = vmin.f32 %v600_v0, 6.0  ;;  %5520 = vst [vmem:[#allocation15_spill] sm:$0xff] %v4420_v18  ;;  %v4445_v1 = vsel %vm835_vm5, %v820_v55, %v5522_v56  ;;  %2588 = vmatpush1.bf16.msra.mxu0 %v4420_v18  ;;  %v5523_v62 = vrot.slane %v4204_v27, 7  ;;  %v5524_v0 = vrot.slane %v4220_v34, 7 }
 0x174   : > { %v4450_v45 = vmul.f32 0.16666667, %v666_v37  ;;  %v5528_v37 = vrot.slane %v4220_v34, 1  ;;  %2589 = vmatprep.subr.bf16.mxu0 %v5494_v58  ;;  %v814_v34 = vrot.slane %v4325_v39, 1  ;;  %v5537_v9 = vrot.slane %v4239_v4, 1 }
 0x175   : > { %v664_v53 = vmul.f32 %v632_v11, %v528_v21  ;;  %v4459_v14 = vsel %vm736_vm3, %v5524_v0, %v5523_v62  ;;  %v5525_v25 = vmov %v5524_v0  ;;  %v5526_v55 = vmov %v5523_v62 }
 0x176   : > { %v4467_v40 = vsel %vm736_vm3, %v5526_v55, %v5525_v25  ;;  %v5527_v21 = vrot.slane %v4204_v27, 1  ;;  %v5529_v48 = vmov %v5528_v37  ;;  %v827_v62 = vrot.slane %v4313_v44, 1 }
 0x177   : > { %v715_v0 = vrot.slane %v4325_v39, 7  ;;  %v4488_v25 = vmul.f32 0.16666667, %v664_v53  ;;  %v3672_v55 = vpack.i.bf16 %v4450_v45, %v4401_v51  ;;  %v714_v27 = vrot.slane %v4338_v57, 7 }
 0x178   : > { %v4475_v11 = vsel %vm835_vm5, %v5528_v37, %v5527_v21  ;;  %v5530_v54 = vmov %v5527_v21  ;;  %v4492_v21 = vld [vmem:[#allocation6 + $0xd0] sm:$0xff]   ;;  %v5532_v37 = vrot.slane %v4234_v59, 7  ;;  %v813_v39 = vrot.slane %v4338_v57, 1 }
 0x179   : > { %v4483_v56 = vsel %vm835_vm5, %v5530_v54, %v5529_v48  ;;  %5531 = vst [vmem:[#allocation16_spill] sm:$0xff] %v4492_v21  ;;  %v5533_v48 = vrot.slane %v4239_v4, 7  ;;  %3673 = vrot.lane.b32.xlu1 %v3672_v55, %s3901_s8  ;;  %2590 = vmatpush1.bf16.msra.mxu0 %v4492_v21  ;;  %v5538_v57 = vmov %v5537_v9  ;;  %v5540_v55 = vrot.slane %v4253_v23, 7 }
 0x17a   : > { %v5535_v54 = vmov %v5532_v37  ;;  %2591 = vmatprep.subr.bf16.mxu0 %v5494_v58  ;;  %v5549_v58 = vrot.slane %v4251_v22, 7  ;;  %v816_v18 = vrot.slane %v4354_v29, 1 }
 0x17b   : > { %v4502_v44 = vsel %vm736_vm3, %v5533_v48, %v5532_v37  ;;  %v5534_v53 = vmov %v5533_v48  ;;  %v3667_v37 = vpack.i.bf16 %v4488_v25, %v4448_v49  ;;  %v5536_v48 = vrot.slane %v4234_v59, 1 }
 0x17c   : > { %v4510_v20 = vsel %vm736_vm3, %v5535_v54, %v5534_v53  ;;  %v4541_v8 = vsel %vm736_vm3, %v5541_v13, %v5540_v55  ;;  %v730_v59 = vrot.slane %v4345_v10, 7  ;;  %v5545_v13 = vrot.slane %v4241_v5, 1 }
 0x17d   : > { %v4525_v53 = vsel %vm835_vm5, %v5537_v9, %v5536_v48  ;;  %v5539_v54 = vmov %v5536_v48  ;;  %v5543_v9 = vmov %v5540_v55  ;;  %v829_v48 = vrot.slane %v4345_v10, 1  ;;  %3668 = vrot.lane.b32.xlu0 %v3667_v37, %s3901_s8 }
 0x17e   : > { %v4533_v26 = vsel %vm835_vm5, %v5539_v54, %v5538_v57  ;;  %v4549_v4 = vsel %vm736_vm3, %v5543_v9, %v5542_v7  ;;  %v5544_v57 = vrot.slane %v4253_v23, 1  ;;  %v5546_v55 = vmov %v5545_v13 }
 0x17f   : > { %v717_v10 = vrot.slane %v4354_v29, 7  ;;  %v5548_v37 = vrot.slane %v4255_v24, 7 }
 0x180   : > { %v4561_v54 = vsel %vm835_vm5, %v5545_v13, %v5544_v57  ;;  %v5547_v7 = vmov %v5544_v57  ;;  %v5550_v57 = vmov %v5549_v58  ;;  %v5552_v13 = vrot.slane %v4255_v24, 1 }
 0x181   : > { %v4569_v9 = vsel %vm835_vm5, %v5547_v7, %v5546_v55  ;;  %v4578_v21 = vsel %vm736_vm3, %v5549_v58, %v5548_v37  ;;  %v5551_v5 = vmov %v5548_v37  ;;  %v5553_v55 = vrot.slane %v4251_v22, 1 }
 0x182   : > { %v4586_v23 = vsel %vm736_vm3, %v5551_v5, %v5550_v57  ;;  %v5555_v37 = vmov %v5552_v13  ;;  %v5556_v57 = vrot.slane %v4264_v38, 7  ;;  %v5557_v5 = vrot.slane %v4262_v35, 7 }
 0x183   : > { %v4594_v7 = vsel %vm835_vm5, %v5553_v55, %v5552_v13  ;;  %v5554_v58 = vmov %v5553_v55  ;;  %v716_v24 = vrot.slane %v4356_v19, 7  ;;  %v815_v55 = vrot.slane %v4356_v19, 1 }
 0x184   : > { %v4603_v2 = vsel %vm835_vm5, %v5555_v37, %v5554_v58  ;;  %v4611_v32 = vsel %vm736_vm3, %v5557_v5, %v5556_v57  ;;  %v5559_v13 = vmov %v5557_v5  ;;  %v5560_v29 = vmov %v5556_v57 }
 0x185   : > { %5558 = vst [vmem:[#allocation17_spill] sm:$0xff] %v4611_v32  ;;  %v4619_v22 = vsel %vm736_vm3, %v5560_v29, %v5559_v13  ;;  %v5562_v58 = vrot.slane %v4264_v38, 1  ;;  %v5563_v37 = vrot.slane %v4262_v35, 1  ;;  %v733_v29 = vrot.slane %v4362_v46, 7 }
 0x186   : > { %5561 = vst [vmem:[#allocation18_spill] sm:$0xff] %v4619_v22  ;;  %v5567_v19 = vrot.slane %v4288_v6, 7  ;;  %v5568_v22 = vrot.slane %v4286_v3, 7 }
 0x187   : > { %v4629_v57 = vsel %vm835_vm5, %v5563_v37, %v5562_v58  ;;  %v5565_v5 = vmov %v5563_v37  ;;  %v5566_v32 = vmov %v5562_v58  ;;  %v5574_v37 = vrot.slane %v4286_v3, 1 }
 0x188   : > { %5564 = vst [vmem:[#allocation19_spill] sm:$0xff] %v4629_v57  ;;  %v4637_v13 = vsel %vm835_vm5, %v5566_v32, %v5565_v5  ;;  %v4646_v61 = vsel %vm736_vm3, %v5568_v22, %v5567_v19  ;;  %v5570_v58 = vmov %v5568_v22  ;;  %v5571_v35 = vmov %v5567_v19 }
 0x189   : > { %5569 = vst [vmem:[#allocation20_spill] sm:$0xff] %v4646_v61  ;;  %v4654_v38 = vsel %vm736_vm3, %v5571_v35, %v5570_v58  ;;  %v5573_v32 = vrot.slane %v4288_v6, 1  ;;  %v832_v57 = vrot.slane %v4362_v46, 1  ;;  %v5576_v22 = vmov %v5574_v37 }
 0x18a   : > { %5572 = vst [vmem:[#allocation21_spill] sm:$0xff] %v4654_v38  ;;  %v5578_v58 = vrot.slane %v4303_v47, 7  ;;  %v5579_v35 = vrot.slane %v4298_v41, 7  ;;  %v732_v6 = vrot.slane %v4384_v30, 7 }
 0x18b   : > { %v4662_v5 = vsel %vm835_vm5, %v5574_v37, %v5573_v32  ;;  %v5577_v19 = vmov %v5573_v32  ;;  %v831_v37 = vrot.slane %v4384_v30, 1  ;;  %v5588_v30 = vrot.slane %v4311_v42, 7 }
 0x18c   : > { %5575 = vst [vmem:[#allocation22_spill] sm:$0xff] %v4662_v5  ;;  %v4671_v61 = vsel %vm835_vm5, %v5577_v19, %v5576_v22  ;;  %v4679_v38 = vsel %vm736_vm3, %v5579_v35, %v5578_v58  ;;  %v5581_v32 = vmov %v5579_v35  ;;  %v5582_v46 = vmov %v5578_v58 }
 0x18d   : > { %5580 = vst [vmem:[#allocation23_spill] sm:$0xff] %v4679_v38  ;;  %v4687_v3 = vsel %vm736_vm3, %v5582_v46, %v5581_v32  ;;  %v5584_v22 = vrot.slane %v4303_v47, 1  ;;  %v5585_v19 = vrot.slane %v4298_v41, 1  ;;  %v719_v46 = vrot.slane %v4401_v51, 7 }
 0x18e   : > { %5583 = vst [vmem:[#allocation24_spill] sm:$0xff] %v4687_v3  ;;  %v4712_v3 = vsel %vm736_vm3, %v5588_v30, %v728_v60  ;;  %v5589_v5 = vmov %v5588_v30  ;;  %v5590_v41 = vrot.slane %v4311_v42, 1  ;;  %v4735_v30 = vsel %vm736_vm3, %v715_v0, %v731_v17 }
 0x18f   : > { %v4697_v58 = vsel %vm835_vm5, %v5585_v19, %v5584_v22  ;;  %v5586_v35 = vmov %v5585_v19  ;;  %v5587_v38 = vmov %v5584_v22  ;;  %v4718_v22 = vsel %vm736_vm3, %v728_v60, %v5589_v5 }
 0x190   : > { %v4705_v32 = vsel %vm835_vm5, %v5587_v38, %v5586_v35  ;;  %v4724_v47 = vsel %vm835_vm5, %v5590_v41, %v827_v62  ;;  %v818_v38 = vrot.slane %v4401_v51, 1  ;;  %v5591_v19 = vmov %v5590_v41 }
 0x191   : > { %v4731_v35 = vsel %vm835_vm5, %v827_v62, %v5591_v19  ;;  %v4739_v60 = vsel %vm736_vm3, %v731_v17, %v715_v0  ;;  %v718_v5 = vrot.slane %v4448_v49, 7  ;;  %v817_v41 = vrot.slane %v4448_v49, 1 }
 0x192   : > { %v4745_v51 = vsel %vm835_vm5, %v814_v34, %v830_v31  ;;  %v4749_v42 = vsel %vm835_vm5, %v830_v31, %v814_v34  ;;  %v735_v62 = vrot.slane %v4450_v45, 7  ;;  %v4754_v19 = vsel %vm736_vm3, %v714_v27, %v730_v59 }
 0x193   : > { %5592 = vst [vmem:[#allocation25_spill] sm:$0xff] %v4754_v19  ;;  %v4758_v17 = vsel %vm736_vm3, %v730_v59, %v714_v27  ;;  %v4762_v49 = vsel %vm835_vm5, %v813_v39, %v829_v48  ;;  %v834_v0 = vrot.slane %v4450_v45, 1  ;;  %v4767_v31 = vsel %vm835_vm5, %v829_v48, %v813_v39  ;;  %v4777_v27 = vld [vmem:[#allocation6 + $0xc8] sm:$0xff]  }
 0x194   : > { %5593 = vst [vmem:[#allocation26_spill] sm:$0xff] %v4762_v49  ;;  %v4771_v34 = vsel %vm736_vm3, %v717_v10, %v733_v29  ;;  %v4775_v19 = vsel %vm736_vm3, %v733_v29, %v717_v10  ;;  %v734_v59 = vrot.slane %v4488_v25, 7  ;;  %v833_v49 = vrot.slane %v4488_v25, 1  ;;  %2592 = vmatpush1.bf16.msra.mxu0 %v4777_v27 }
 0x195   : > { %v4783_v45 = vsel %vm835_vm5, %v816_v18, %v832_v57  ;;  %v4787_v39 = vsel %vm835_vm5, %v832_v57, %v816_v18  ;;  %v4791_v48 = vsel %vm736_vm3, %v716_v24, %v732_v6  ;;  %v4795_v10 = vsel %vm736_vm3, %v732_v6, %v716_v24 }
 0x196   : > { %v4799_v29 = vsel %vm835_vm5, %v815_v55, %v831_v37  ;;  %v4804_v25 = vsel %vm835_vm5, %v831_v37, %v815_v55  ;;  %v4808_v18 = vsel %vm736_vm3, %v719_v46, %v735_v62  ;;  %v4812_v57 = vsel %vm736_vm3, %v735_v62, %v719_v46 }
 0x197   : > { %5594 = vst [vmem:[#allocation27_spill] sm:$0xff] %v4799_v29  ;;  %5595 = vst [vmem:[#allocation28_spill] sm:$0xff] %v4808_v18  ;;  %v5597_v24 = vmov 0   ;;  %v4817_v6 = vsel %vm835_vm5, %v818_v38, %v834_v0  ;;  %v4821_v29 = vsel %vm835_vm5, %v834_v0, %v818_v38  ;;  %v4825_v55 = vsel %vm736_vm3, %v718_v5, %v734_v59  ;;  %v4843_v38 = vld [vmem:[#allocation6 + $0x118] sm:$0xff]  }
 0x198   : > { %5596 = vst [vmem:[#allocation29_spill] sm:$0xff] %v4812_v57  ;;  %2593 = vmatprep.subr.bf16.mxu0 %v5597_v24  ;;  %5598 = vst [vmem:[#allocation30_spill] sm:$0xff] %v4817_v6  ;;  %v4829_v37 = vsel %vm736_vm3, %v734_v59, %v718_v5  ;;  %v4833_v46 = vsel %vm835_vm5, %v817_v41, %v833_v49  ;;  %v4837_v62 = vsel %vm835_vm5, %v833_v49, %v817_v41  ;;  %v4839_v6 = vld [vmem:[#allocation6 + $0xc0] sm:$0xff]   ;;  %v4847_v5 = vld [vmem:[#allocation6 + $0x110] sm:$0xff]  }
 0x199   : > { %5599 = vst [vmem:[#allocation31_spill] sm:$0xff] %v4821_v29  ;;  %5600 = vst [vmem:[#allocation32_spill] sm:$0xff] %v4825_v55  ;;  %2594 = vmatpush1.bf16.msra.mxu0 %v4839_v6  ;;  %v4851_v41 = vld [vmem:[#allocation6 + $0x108] sm:$0xff]   ;;  %v4856_v49 = vadd.s32 8, %v4176_v43  ;;  %v769_v55 = vsel %vm702_vm6, 0.0, %v4372_v15 }
 0x19a   : > { %5601 = vst [vmem:[#allocation33_spill] sm:$0xff] %v4829_v37  ;;  %5602 = vst [vmem:[#allocation34_spill] sm:$0xff] %v4833_v46  ;;  %2603 = vmatprep.subr.bf16.mxu0 %v5597_v24 }
 0x19b   : > { %5603 = vst [vmem:[#allocation35_spill] sm:$0xff] %v4837_v62  ;;  %5604 = vst [vmem:[#allocation36_spill] sm:$0xff] %v4843_v38  ;;  %vm802_vm7 = vcmp.eq.s32.totalorder %v4856_v49, 15  ;;  %v4863_v62 = vld [vmem:[#allocation6 + $0x100] sm:$0xff]  }
 0x19c   : > { %5605 = vst [vmem:[#allocation37_spill] sm:$0xff] %v4847_v5  ;;  %5606 = vst [vmem:[#allocation38_spill] sm:$0xff] %v4851_v41 }
 0x19d   : > { %2604 = vmatpush2.bf16.msra.mxu0 %v4843_v38 }
 0x19e   : > { %2605 = vmatprep.subr.bf16.mxu0 %v5597_v24 }
 0x1a1   : > { %2606 = vmatpush2.bf16.msra.mxu0 %v4847_v5 }
 0x1a2   : > { %2607 = vmatprep.subr.bf16.mxu0 %v5597_v24 }
 0x1a5   : > { %2608 = vmatpush2.bf16.msra.mxu0 %v4851_v41  ;;  %v869_v41 = vsel %vm802_vm7, 0.0, %v4410_v36  ;;  %v771_v36 = vsel %vm702_vm6, 0.0, %v4429_v52 }
 0x1a6   : > { %2609 = vmatprep.subr.bf16.mxu0 %v5597_v24 }
 0x1a9   : > { %2610 = vmatpush2.bf16.msra.mxu0 %v4863_v62 }
 0x1b5   : > { %v3599_v0 = vpop.permute.xlu0 %3598 }
 0x1b6   : > { %v3601_v59 = vunpack.i.h.bf16 %v3599_v0  ;;  %v3600_v46 = vunpack.i.l.bf16 %v3599_v0 }
 0x1b8   : > { %v1029_v37 = vsel %vm1028_vm4, %v769_v55, %v3600_v46  ;;  %v1030_v18 = vsel %vm1028_vm4, %v4217_v33, %v3601_v59  ;;  %v871_v33 = vsel %vm802_vm7, 0.0, %v4445_v1  ;;  %v875_v59 = vsel %vm802_vm7, 0.0, %v4533_v26 }
 0x1b9   : > { %v3403_v29 = vpack.c.bf16 %v4380_v12, %v1029_v37  ;;  %v3404_v0 = vpack.c.bf16 %v869_v41, %v1030_v18  ;;  %v3604_v57 = vpop.permute.xlu0 %3603  ;;  %v873_v37 = vsel %vm802_vm7, 0.0, %v4483_v56 }
 0x1ba   : > { %v3606_v5 = vunpack.i.h.bf16 %v3604_v57  ;;  %v3605_v38 = vunpack.i.l.bf16 %v3604_v57 }
 0x1bb   : > { %1262 = vst.msk [vmem:[#allocation2 + $0x10] sm:$0xff] %vm4127_vm2, %v3403_v29  ;;  %1263 = vst.msk [vmem:[#allocation2 + $0x18] sm:$0xff] %vm4127_vm2, %v3404_v0  ;;  %v773_v29 = vsel %vm702_vm6, 0.0, %v4467_v40 }
 0x1bc   : > { %v3609_v15 = vpop.permute.xlu1 %3608  ;;  %v1032_v57 = vsel %vm1028_vm4, %v4418_v28, %v3606_v5  ;;  %v1031_v55 = vsel %vm1028_vm4, %v771_v36, %v3605_v38 }
 0x1bd   : > { %v3611_v12 = vunpack.i.h.bf16 %v3609_v15  ;;  %v3610_v18 = vunpack.i.l.bf16 %v3609_v15  ;;  %v3406_v52 = vpack.c.bf16 %v871_v33, %v1032_v57  ;;  %v3405_v46 = vpack.c.bf16 %v4437_v50, %v1031_v55 }
 0x1be   : > { %v779_v55 = vsel %vm702_vm6, 0.0, %v4549_v4 }
 0x1bf   : > { %v1033_v1 = vsel %vm1028_vm4, %v773_v29, %v3610_v18  ;;  %v1034_v41 = vsel %vm1028_vm4, %v4459_v14, %v3611_v12  ;;  %1265 = vst.msk [vmem:[#allocation2 + $0x28] sm:$0xff] %vm4127_vm2, %v3406_v52  ;;  %1264 = vst.msk [vmem:[#allocation2 + $0x20] sm:$0xff] %vm4127_vm2, %v3405_v46  ;;  %v775_v14 = vsel %vm702_vm6, 0.0, %v4510_v20  ;;  %v879_v29 = vsel %vm802_vm7, 0.0, %v4569_v9 }
 0x1c0   : > { %v3407_v28 = vpack.c.bf16 %v4475_v11, %v1033_v1  ;;  %v3408_v5 = vpack.c.bf16 %v873_v37, %v1034_v41  ;;  %v3614_v50 = vpop.permute.xlu1 %3613  ;;  %v777_v37 = vsel %vm702_vm6, 0.0, %v4586_v23  ;;  %v877_v52 = vsel %vm802_vm7, 0.0, %v4603_v2 }
 0x1c1   : > { %v3616_v40 = vunpack.i.h.bf16 %v3614_v50  ;;  %v3615_v56 = vunpack.i.l.bf16 %v3614_v50 }
 0x1c2   : > { %1266 = vst.msk [vmem:[#allocation2 + $0x30] sm:$0xff] %vm4127_vm2, %v3407_v28  ;;  %1267 = vst.msk [vmem:[#allocation2 + $0x38] sm:$0xff] %vm4127_vm2, %v3408_v5  ;;  %v3712_v38 = vld [vmem:[#allocation2 + $0x10] ss:$8 sps:$4 sm:$0xff]   ;;  %v3714_v11 = vld [vmem:[#allocation2 + $0x14] ss:$8 sps:$4 sm:$0xff]  }
 0x1c3   : > { %v1036_v0 = vsel %vm1028_vm4, %v4502_v44, %v3616_v40  ;;  %v1035_v15 = vsel %vm1028_vm4, %v775_v14, %v3615_v56  ;;  %3260 = vmatprep.mubr.msk.bf16.mxu1 %vm1028_vm4, %v3714_v11  ;;  %3321 = vmatprep.mubr.msk.bf16.mxu0 %vm1028_vm4, %v3714_v11  ;;  %v5607_v56 = vld [vmem:[#allocation12_spill] sm:$0xff]  ;;  %v5609_v14 = vld [vmem:[#allocation17_spill] sm:$0xff] }
 0x1c4   : > { %v3410_v36 = vpack.c.bf16 %v875_v59, %v1036_v0  ;;  %v3409_v33 = vpack.c.bf16 %v4525_v53, %v1035_v15  ;;  %v3624_v12 = vpop.permute.xlu1 %3623  ;;  %1704 = vmatmul.mubr.bf16.vlgmr.msra.gmra.mxu1 %v3712_v38  ;;  %2137 = vmatmul.mubr.bf16.gmra.mxu0 %v3712_v38  ;;  %v883_v38 = vsel %vm802_vm7, 0.0, %v4637_v13  ;;  %v5611_v13 = vld [vmem:[#allocation21_spill] sm:$0xff] }
 0x1c5   : > { %v3619_v18 = vpop.permute.xlu0 %3618  ;;  %v3626_v44 = vunpack.i.h.bf16 %v3624_v12  ;;  %v3625_v26 = vunpack.i.l.bf16 %v3624_v12  ;;  %3520 = vmatpush1.bf16.msra.mxu1 %v4244_v16 }
 0x1c6   : > { %v4917_v20 = vld [vmem:[#allocation2 + $0x24] ss:$8 sps:$4 sm:$0xff]   ;;  %1269 = vst.msk [vmem:[#allocation2 + $0x48] sm:$0xff] %vm4127_vm2, %v3410_v36  ;;  %1268 = vst.msk [vmem:[#allocation2 + $0x40] sm:$0xff] %vm4127_vm2, %v3409_v33  ;;  %v3621_v57 = vunpack.i.h.bf16 %v3619_v18  ;;  %v3620_v53 = vunpack.i.l.bf16 %v3619_v18  ;;  %3509 = vmatprep.subr.bf16.mxu1 %v5597_v24  ;;  %v5610_v36 = vld [vmem:[#allocation19_spill] sm:$0xff] }
 0x1c7   : > { %3261 = vmatprep.mubr.msk.bf16.mxu1 %vm1028_vm4, %v4917_v20  ;;  %3322 = vmatprep.mubr.msk.bf16.mxu0 %vm1028_vm4, %v4917_v20  ;;  %v1040_v16 = vsel %vm1028_vm4, %v4541_v8, %v3626_v44  ;;  %v1039_v4 = vsel %vm1028_vm4, %v779_v55, %v3625_v26  ;;  %v1352_v46 = vld [vmem:[#allocation2 + $0x20] sm:$0xff]  ;;  %v1353_v1 = vld [vmem:[#allocation2 + $0x28] sm:$0xff]  ;;  %v781_v26 = vsel %vm702_vm6, 0.0, %v5611_v13 }
 0x1c8   : > { %v1038_v9 = vsel %vm1028_vm4, %v4578_v21, %v3621_v57  ;;  %v1037_v23 = vsel %vm1028_vm4, %v777_v37, %v3620_v53  ;;  %v3414_v2 = vpack.c.bf16 %v879_v29, %v1040_v16  ;;  %v3413_v41 = vpack.c.bf16 %v4561_v54, %v1039_v4  ;;  %v5608_v21 = vld [vmem:[#allocation18_spill] sm:$0xff]  ;;  %v5612_v57 = vld [vmem:[#allocation13_spill] sm:$0xff]  ;;  %v5613_v55 = vld [vmem:[#allocation20_spill] sm:$0xff] }
 0x1c9   : > { %v3412_v28 = vpack.c.bf16 %v877_v52, %v1038_v9  ;;  %v3411_v5 = vpack.c.bf16 %v4594_v7, %v1037_v23  ;;  %3521 = vmatpush1.bf16.msra.mxu1 %v5607_v56  ;;  %v783_v54 = vsel %vm702_vm6, 0.0, %v5608_v21  ;;  %v4961_v7 = vcombine.low %v1352_v46, %v1353_v1  ;;  %v4970_v0 = vld [vmem:[#allocation2 + $0x34] ss:$8 sps:$4 sm:$0xff]  }
 0x1ca   : > { %v3634_v50 = vpop.permute.xlu1 %3633  ;;  %1273 = vst.msk [vmem:[#allocation2 + $0x68] sm:$0xff] %vm4127_vm2, %v3414_v2  ;;  %1272 = vst.msk [vmem:[#allocation2 + $0x60] sm:$0xff] %vm4127_vm2, %v3413_v41  ;;  %3510 = vmatprep.subr.bf16.mxu1 %v5597_v24  ;;  %v881_v53 = vsel %vm802_vm7, 0.0, %v4671_v61  ;;  %v1354_v52 = vld [vmem:[#allocation2 + $0x30] sm:$0xff]  ;;  %v1355_v16 = vld [vmem:[#allocation2 + $0x38] sm:$0xff] }
 0x1cb   : > { %v3636_v40 = vunpack.i.h.bf16 %v3634_v50  ;;  %v3635_v8 = vunpack.i.l.bf16 %v3634_v50  ;;  %1271 = vst.msk [vmem:[#allocation2 + $0x58] sm:$0xff] %vm4127_vm2, %v3412_v28  ;;  %1270 = vst.msk [vmem:[#allocation2 + $0x50] sm:$0xff] %vm4127_vm2, %v3411_v5  ;;  %v5614_v9 = vld [vmem:[#allocation22_spill] sm:$0xff]  ;;  %v4999_v2 = vcombine.low %v1354_v52, %v1355_v16  ;;  %v5616_v28 = vld [vmem:[#allocation24_spill] sm:$0xff] }
 0x1cc   : > { %v3629_v12 = vpop.permute.xlu0 %3628  ;;  %1712 = vmatmul.mubr.bf16.gmra.mxu1 %v4961_v7  ;;  %2145 = vmatmul.mubr.bf16.gmra.mxu0 %v4961_v7  ;;  %v5615_v41 = vld [vmem:[#allocation14_spill] sm:$0xff]  ;;  %v787_v5 = vsel %vm702_vm6, 0.0, %v5616_v28 }
 0x1cd   : > { %v1044_v11 = vsel %vm1028_vm4, %v5609_v14, %v3636_v40  ;;  %v1043_v59 = vsel %vm1028_vm4, %v783_v54, %v3635_v8  ;;  %v3631_v18 = vunpack.i.h.bf16 %v3629_v12  ;;  %v3630_v44 = vunpack.i.l.bf16 %v3629_v12  ;;  %3262 = vmatprep.mubr.msk.bf16.mxu1 %vm1028_vm4, %v4970_v0  ;;  %3323 = vmatprep.mubr.msk.bf16.mxu0 %vm1028_vm4, %v4970_v0  ;;  %v5005_v50 = vld [vmem:[#allocation2 + $0x44] ss:$8 sps:$4 sm:$0xff]   ;;  %v5617_v8 = vld [vmem:[#allocation23_spill] sm:$0xff]  ;;  %v5621_v28 = vld [vmem:[#allocation26_spill] sm:$0xff] }
 0x1ce   : > { %v3418_v15 = vpack.c.bf16 %v883_v38, %v1044_v11  ;;  %v3417_v33 = vpack.c.bf16 %v5610_v36, %v1043_v59  ;;  %3522 = vmatpush1.bf16.msra.mxu1 %v5612_v57  ;;  %v887_v40 = vsel %vm802_vm7, 0.0, %v4705_v32  ;;  %v5618_v59 = vld [vmem:[#allocation15_spill] sm:$0xff]  ;;  %v1357_v36 = vld [vmem:[#allocation2 + $0x48] sm:$0xff] }
 0x1cf   : > { %v1042_v29 = vsel %vm1028_vm4, %v5613_v55, %v3631_v18  ;;  %v1041_v37 = vsel %vm1028_vm4, %v781_v26, %v3630_v44  ;;  %3511 = vmatprep.subr.bf16.mxu1 %v5597_v24 }
 0x1d0   : > { %1277 = vst.msk [vmem:[#allocation2 + $0x88] sm:$0xff] %vm4127_vm2, %v3418_v15  ;;  %1276 = vst.msk [vmem:[#allocation2 + $0x80] sm:$0xff] %vm4127_vm2, %v3417_v33  ;;  %v3416_v4 = vpack.c.bf16 %v881_v53, %v1042_v29  ;;  %v3415_v23 = vpack.c.bf16 %v5614_v9, %v1041_v37  ;;  %v1356_v15 = vld [vmem:[#allocation2 + $0x40] sm:$0xff]  ;;  %v885_v33 = vsel %vm802_vm7, 0.0, %v4731_v35 }
 0x1d1   : > { %v5040_v55 = vcombine.low %v1356_v15, %v1357_v36  ;;  %v5619_v29 = vld [vmem:[#allocation16_spill] sm:$0xff]  ;;  %v5623_v15 = vld [vmem:[#allocation27_spill] sm:$0xff] }
 0x1d2   : > { %1275 = vst.msk [vmem:[#allocation2 + $0x78] sm:$0xff] %vm4127_vm2, %v3416_v4  ;;  %1274 = vst.msk [vmem:[#allocation2 + $0x70] sm:$0xff] %vm4127_vm2, %v3415_v23  ;;  %3523 = vmatpush1.bf16.msra.mxu1 %v5615_v41  ;;  %v1358_v4 = vld [vmem:[#allocation2 + $0x50] sm:$0xff]  ;;  %v1359_v9 = vld [vmem:[#allocation2 + $0x58] sm:$0xff]  ;;  %v889_v23 = vsel %vm802_vm7, 0.0, %v4767_v31  ;;  %v795_v31 = vsel %vm702_vm6, 0.0, %v4775_v19 }
 0x1d3   : > { %v3644_v46 = vpop.permute.xlu1 %3643  ;;  %3512 = vmatprep.subr.bf16.mxu1 %v5597_v24 }
 0x1d4   : > { %v3646_v61 = vunpack.i.h.bf16 %v3644_v46  ;;  %v3645_v1 = vunpack.i.l.bf16 %v3644_v46  ;;  %1720 = vmatmul.mubr.bf16.gmra.mxu1 %v4999_v2  ;;  %2153 = vmatmul.mubr.bf16.gmra.mxu0 %v4999_v2  ;;  %v5620_v46 = vld [vmem:[#allocation25_spill] sm:$0xff] }
 0x1d5   : > { %v3639_v14 = vpop.permute.xlu0 %3638  ;;  %3263 = vmatprep.mubr.msk.bf16.mxu1 %vm1028_vm4, %v5005_v50  ;;  %3324 = vmatprep.mubr.msk.bf16.mxu0 %vm1028_vm4, %v5005_v50 }
 0x1d6   : > { %v1048_v56 = vsel %vm1028_vm4, %v5617_v8, %v3646_v61  ;;  %v1047_v21 = vsel %vm1028_vm4, %v787_v5, %v3645_v1  ;;  %v3641_v32 = vunpack.i.h.bf16 %v3639_v14  ;;  %v3640_v11 = vunpack.i.l.bf16 %v3639_v14  ;;  %3524 = vmatpush1.bf16.msra.mxu1 %v5618_v59 }
 0x1d7   : > { %v3422_v54 = vpack.c.bf16 %v887_v40, %v1048_v56  ;;  %v3421_v38 = vpack.c.bf16 %v4697_v58, %v1047_v21  ;;  %v785_v58 = vsel %vm702_vm6, 0.0, %v4718_v22  ;;  %3513 = vmatprep.subr.bf16.mxu1 %v5597_v24  ;;  %v791_v22 = vsel %vm702_vm6, 0.0, %v4739_v60  ;;  %v5053_v60 = vld [vmem:[#allocation2 + $0x54] ss:$8 sps:$4 sm:$0xff]  }
 0x1d8   : > { %v1046_v12 = vsel %vm1028_vm4, %v4712_v3, %v3641_v32  ;;  %v1045_v18 = vsel %vm1028_vm4, %v785_v58, %v3640_v11  ;;  %v891_v3 = vsel %vm802_vm7, 0.0, %v4749_v42  ;;  %v895_v56 = vsel %vm802_vm7, 0.0, %v4787_v39 }
 0x1d9   : > { %1281 = vst.msk [vmem:[#allocation2 + $0xa8] sm:$0xff] %vm4127_vm2, %v3422_v54  ;;  %1280 = vst.msk [vmem:[#allocation2 + $0xa0] sm:$0xff] %vm4127_vm2, %v3421_v38  ;;  %v3420_v13 = vpack.c.bf16 %v885_v33, %v1046_v12  ;;  %v3419_v26 = vpack.c.bf16 %v4724_v47, %v1045_v18  ;;  %v5092_v54 = vld [vmem:[#allocation2 + $0x64] ss:$8 sps:$4 sm:$0xff]   ;;  %v793_v39 = vsel %vm702_vm6, 0.0, %v4795_v10 }
 0x1da   : > { %3525 = vmatpush1.bf16.msra.mxu1 %v5619_v29  ;;  %v1360_v33 = vld [vmem:[#allocation2 + $0x60] sm:$0xff]  ;;  %v1361_v12 = vld [vmem:[#allocation2 + $0x68] sm:$0xff]  ;;  %v5167_v49 = vld [vmem:[#allocation2 + $0x70] ss:$8 sps:$4 sm:$0xff]  }
 0x1db   : > { %v3654_v44 = vpop.permute.xlu1 %3653  ;;  %1279 = vst.msk [vmem:[#allocation2 + $0x98] sm:$0xff] %vm4127_vm2, %v3420_v13  ;;  %1278 = vst.msk [vmem:[#allocation2 + $0x90] sm:$0xff] %vm4127_vm2, %v3419_v26  ;;  %3514 = vmatprep.subr.bf16.mxu1 %v5597_v24  ;;  %v5624_v13 = vld [vmem:[#allocation37_spill] sm:$0xff] }
 0x1dc   : > { %v3656_v57 = vunpack.i.h.bf16 %v3654_v44  ;;  %v3655_v53 = vunpack.i.l.bf16 %v3654_v44  ;;  %1728 = vmatmul.mubr.bf16.gmra.mxu1 %v5040_v55  ;;  %2161 = vmatmul.mubr.bf16.gmra.mxu0 %v5040_v55  ;;  %v5125_v44 = vcombine.low %v1360_v33, %v1361_v12  ;;  %v5625_v26 = vld [vmem:[#allocation29_spill] sm:$0xff] }
 0x1dd   : > { %v3649_v16 = vpop.permute.xlu0 %3648  ;;  %3264 = vmatprep.mubr.msk.bf16.mxu1 %vm1028_vm4, %v5053_v60  ;;  %3325 = vmatprep.mubr.msk.bf16.mxu0 %vm1028_vm4, %v5053_v60 }
 0x1de   : > { %v1052_v47 = vsel %vm1028_vm4, %v4735_v30, %v3656_v57  ;;  %v1051_v35 = vsel %vm1028_vm4, %v791_v22, %v3655_v53  ;;  %v3651_v30 = vunpack.i.h.bf16 %v3649_v16  ;;  %v3650_v42 = vunpack.i.l.bf16 %v3649_v16  ;;  %3526 = vmatpush1.bf16.msra.mxu1 %v4777_v27  ;;  %v5626_v53 = vld [vmem:[#allocation31_spill] sm:$0xff] }
 0x1df   : > { %v3426_v37 = vpack.c.bf16 %v891_v3, %v1052_v47  ;;  %v3425_v52 = vpack.c.bf16 %v4745_v51, %v1051_v35  ;;  %v789_v51 = vsel %vm702_vm6, 0.0, %v4758_v17  ;;  %3515 = vmatprep.subr.bf16.mxu1 %v5597_v24  ;;  %v5079_v17 = vcombine.low %v1358_v4, %v1359_v9  ;;  %v5134_v3 = vld [vmem:[#allocation2 + $0x74] ss:$8 sps:$4 sm:$0xff]   ;;  %v5627_v47 = vld [vmem:[#allocation28_spill] sm:$0xff]  ;;  %v5629_v4 = vld [vmem:[#allocation33_spill] sm:$0xff] }
 0x1e0   : > { %v1050_v61 = vsel %vm1028_vm4, %v5620_v46, %v3651_v30  ;;  %v1049_v1 = vsel %vm1028_vm4, %v789_v51, %v3650_v42  ;;  %v799_v57 = vsel %vm702_vm6, 0.0, %v5625_v26  ;;  %v899_v22 = vsel %vm802_vm7, 0.0, %v5626_v53  ;;  %v5628_v42 = vld [vmem:[#allocation30_spill] sm:$0xff] }
 0x1e1   : > { %1285 = vst.msk [vmem:[#allocation2 + $0xc8] sm:$0xff] %vm4127_vm2, %v3426_v37  ;;  %1284 = vst.msk [vmem:[#allocation2 + $0xc0] sm:$0xff] %vm4127_vm2, %v3425_v52  ;;  %v3424_v41 = vpack.c.bf16 %v889_v23, %v1050_v61  ;;  %v3423_v27 = vpack.c.bf16 %v5621_v28, %v1049_v1  ;;  %v797_v9 = vsel %vm702_vm6, 0.0, %v5629_v4  ;;  %v5630_v23 = vld [vmem:[#allocation35_spill] sm:$0xff]  ;;  %v5631_v61 = vld [vmem:[#allocation32_spill] sm:$0xff] }
 0x1e2   : > { %3527 = vmatpush1.bf16.msra.mxu1 %v4839_v6  ;;  %v897_v46 = vsel %vm802_vm7, 0.0, %v5630_v23  ;;  %v5632_v28 = vld [vmem:[#allocation38_spill] sm:$0xff] }
 0x1e3   : > { %v3664_v5 = vpop.permute.xlu1 %3663  ;;  %1283 = vst.msk [vmem:[#allocation2 + $0xb8] sm:$0xff] %vm4127_vm2, %v3424_v41  ;;  %1282 = vst.msk [vmem:[#allocation2 + $0xb0] sm:$0xff] %vm4127_vm2, %v3423_v27  ;;  %3516 = vmatprep.subr.bf16.mxu1 %v5597_v24  ;;  %v5633_v27 = vld [vmem:[#allocation34_spill] sm:$0xff] }
 0x1e4   : > { %v3666_v40 = vunpack.i.h.bf16 %v3664_v5  ;;  %v3665_v8 = vunpack.i.l.bf16 %v3664_v5  ;;  %v3659_v21 = vpop.permute.xlu0 %3658  ;;  %1736 = vmatmul.mubr.bf16.gmra.mxu1 %v5079_v17  ;;  %2169 = vmatmul.mubr.bf16.gmra.mxu0 %v5079_v17  ;;  %v3739_v63 = vld [vmem:[#allocation2 + $0x90] ss:$8 sps:$4 sm:$0xff]  }
 0x1e5   : > { %v3661_v14 = vunpack.i.h.bf16 %v3659_v21  ;;  %v3660_v32 = vunpack.i.l.bf16 %v3659_v21  ;;  %3265 = vmatprep.mubr.msk.bf16.mxu1 %vm1028_vm4, %v5092_v54  ;;  %3326 = vmatprep.mubr.msk.bf16.mxu0 %vm1028_vm4, %v5092_v54  ;;  %v3769_v26 = vld [vmem:[#allocation2 + $0x110] ss:$8 sps:$4 sm:$0xff]  }
 0x1e6   : > { %v1056_v6 = vsel %vm1028_vm4, %v4771_v34, %v3666_v40  ;;  %v1055_v38 = vsel %vm1028_vm4, %v795_v31, %v3665_v8  ;;  %v893_v34 = vsel %vm802_vm7, 0.0, %v4804_v25  ;;  %v5170_v40 = vld [vmem:[#allocation2 + $0x84] ss:$8 sps:$4 sm:$0xff]   ;;  %v5178_v8 = vld [vmem:[#allocation2 + $0x94] ss:$8 sps:$4 sm:$0xff]  }
 0x1e7   : > { %v3430_v19 = vpack.c.bf16 %v895_v56, %v1056_v6  ;;  %v3429_v11 = vpack.c.bf16 %v4783_v45, %v1055_v38  ;;  %v1054_v59 = vsel %vm1028_vm4, %v4791_v48, %v3661_v14  ;;  %v1053_v58 = vsel %vm1028_vm4, %v793_v39, %v3660_v32  ;;  %v5622_v45 = vld [vmem:[#allocation36_spill] sm:$0xff] }
 0x1e8   : > { %3528 = vmatpush2.bf16.msra.mxu1 %v5622_v45  ;;  %v3428_v10 = vpack.c.bf16 %v893_v34, %v1054_v59  ;;  %v3427_v36 = vpack.c.bf16 %v5623_v15, %v1053_v58  ;;  %v3741_v31 = vld [vmem:[#allocation2 + $0xa4] ss:$8 sps:$4 sm:$0xff]   ;;  %v3743_v38 = vld [vmem:[#allocation2 + $0xa0] ss:$8 sps:$4 sm:$0xff]  }
 0x1e9   : > { %1289 = vst.msk [vmem:[#allocation2 + $0xe8] sm:$0xff] %vm4127_vm2, %v3430_v19  ;;  %1288 = vst.msk [vmem:[#allocation2 + $0xe0] sm:$0xff] %vm4127_vm2, %v3429_v11  ;;  %3517 = vmatprep.subr.bf16.mxu1 %v5597_v24  ;;  %v3748_v19 = vld [vmem:[#allocation2 + $0xc4] ss:$8 sps:$4 sm:$0xff]   ;;  %v3751_v11 = vld [vmem:[#allocation2 + $0xc0] ss:$8 sps:$4 sm:$0xff]  }
 0x1ea   : > { %1287 = vst.msk [vmem:[#allocation2 + $0xd8] sm:$0xff] %vm4127_vm2, %v3428_v10  ;;  %1286 = vst.msk [vmem:[#allocation2 + $0xd0] sm:$0xff] %vm4127_vm2, %v3427_v36  ;;  %v3744_v14 = vld [vmem:[#allocation2 + $0xb4] ss:$8 sps:$4 sm:$0xff]   ;;  %v3747_v32 = vld [vmem:[#allocation2 + $0xb0] ss:$8 sps:$4 sm:$0xff]  }
 0x1eb   : > { %v3674_v48 = vpop.permute.xlu1 %3673 }
 0x1ec   : > { %v3676_v25 = vunpack.i.h.bf16 %v3674_v48  ;;  %v3675_v18 = vunpack.i.l.bf16 %v3674_v48  ;;  %3529 = vmatpush2.bf16.msra.mxu1 %v5624_v13  ;;  %2177 = vmatmul.mubr.bf16.gmra.mxu0 %v5125_v44 }
 0x1ed   : > { %3518 = vmatprep.subr.bf16.mxu1 %v5597_v24  ;;  %1744 = vmatmul.mubr.bf16.gmra.mxu1 %v5125_v44 }
 0x1ee   : > { %v1060_v35 = vsel %vm1028_vm4, %v5627_v47, %v3676_v25  ;;  %v1059_v37 = vsel %vm1028_vm4, %v799_v57, %v3675_v18  ;;  %3266 = vmatprep.mubr.msk.bf16.mxu1 %vm1028_vm4, %v5134_v3  ;;  %3327 = vmatprep.mubr.msk.bf16.mxu0 %vm1028_vm4, %v5134_v3 }
 0x1ef   : > { %v3669_v29 = vpop.permute.xlu0 %3668  ;;  %v3434_v30 = vpack.c.bf16 %v899_v22, %v1060_v35  ;;  %v3433_v51 = vpack.c.bf16 %v5628_v42, %v1059_v37 }
 0x1f0   : > { %v3671_v52 = vunpack.i.h.bf16 %v3669_v29  ;;  %v3670_v16 = vunpack.i.l.bf16 %v3669_v29  ;;  %3530 = vmatpush2.bf16.msra.mxu1 %v5632_v28  ;;  %v3756_v59 = vld [vmem:[#allocation2 + $0xe4] ss:$8 sps:$4 sm:$0xff]   ;;  %v3758_v58 = vld [vmem:[#allocation2 + $0xe0] ss:$8 sps:$4 sm:$0xff]  }
 0x1f1   : > { %1293 = vst.msk [vmem:[#allocation2 + $0x108] sm:$0xff] %vm4127_vm2, %v3434_v30  ;;  %1292 = vst.msk [vmem:[#allocation2 + $0x100] sm:$0xff] %vm4127_vm2, %v3433_v51  ;;  %3519 = vmatprep.subr.bf16.mxu1 %v5597_v24  ;;  %v3736_v24 = vld [vmem:[#allocation2 + $0x80] ss:$8 sps:$4 sm:$0xff]   ;;  %v3752_v39 = vld [vmem:[#allocation2 + $0xd4] ss:$8 sps:$4 sm:$0xff]  }
 0x1f2   : > { %v1058_v1 = vsel %vm1028_vm4, %v5631_v61, %v3671_v52  ;;  %v1057_v41 = vsel %vm1028_vm4, %v797_v9, %v3670_v16  ;;  %v3754_v34 = vld [vmem:[#allocation2 + $0xd0] ss:$8 sps:$4 sm:$0xff]  }
 0x1f3   : > { %v3432_v43 = vpack.c.bf16 %v897_v46, %v1058_v1  ;;  %v3431_v5 = vpack.c.bf16 %v5633_v27, %v1057_v41 }
 0x1f4   : > { %3531 = vmatpush2.bf16.msra.mxu1 %v4863_v62  ;;  %2185 = vmatmul.mubr.bf16.gmra.mxu0 %v5167_v49 }
 0x1f5   : > { %1291 = vst.msk [vmem:[#allocation2 + $0xf8] sm:$0xff] %vm4127_vm2, %v3432_v43  ;;  %1290 = vst.msk [vmem:[#allocation2 + $0xf0] sm:$0xff] %vm4127_vm2, %v3431_v5  ;;  %1752 = vmatmul.mubr.bf16.gmra.mxu1 %v5167_v49  ;;  %3328 = vmatprep.mubr.msk.bf16.mxu0 %vm1028_vm4, %v5170_v40 }
 0x1f6   : > { %3267 = vmatprep.mubr.msk.bf16.mxu1 %vm1028_vm4, %v5170_v40  ;;  %v5184_v62 = vpop.f32.mrf.mxu0 }
 0x1f8   : > { %v2132_v56 = vpop.f32.mrf.mxu0  ;;  %v3763_v15 = vld [vmem:[#allocation2 + $0x104] ss:$8 sps:$4 sm:$0xff]   ;;  %v3766_v36 = vld [vmem:[#allocation2 + $0x100] ss:$8 sps:$4 sm:$0xff]  }
 0x1fa   : > { %v5188_v21 = vpop.f32.mrf.mxu0 }
 0x1fc   : > { %2193 = vmatmul.mubr.bf16.gmra.mxu0 %v3736_v24  ;;  %v2135_v6 = vpop.f32.mrf.mxu0  ;;  %v3759_v45 = vld [vmem:[#allocation2 + $0xf4] ss:$8 sps:$4 sm:$0xff]   ;;  %v3762_v10 = vld [vmem:[#allocation2 + $0xf0] ss:$8 sps:$4 sm:$0xff]  }
 0x1fd   : > { %1760 = vmatmul.mubr.bf16.gmra.mxu1 %v3736_v24  ;;  %3329 = vmatprep.mubr.msk.bf16.mxu0 %vm1028_vm4, %v5178_v8 }
 0x1fe   : > { %3268 = vmatprep.mubr.msk.bf16.mxu1 %vm1028_vm4, %v5178_v8 }
 0x204   : > { %2201 = vmatmul.mubr.bf16.gmra.mxu0 %v3739_v63 }
 0x205   : > { %1768 = vmatmul.mubr.bf16.gmra.mxu1 %v3739_v63  ;;  %3330 = vmatprep.mubr.msk.bf16.mxu0 %vm1028_vm4, %v3741_v31 }
 0x206   : > { %3269 = vmatprep.mubr.msk.bf16.mxu1 %vm1028_vm4, %v3741_v31 }
 0x20c   : > { %2209 = vmatmul.mubr.bf16.gmra.mxu0 %v3743_v38 }
 0x20d   : > { %1776 = vmatmul.mubr.bf16.gmra.mxu1 %v3743_v38  ;;  %3331 = vmatprep.mubr.msk.bf16.mxu0 %vm1028_vm4, %v3744_v14 }
 0x20e   : > { %3270 = vmatprep.mubr.msk.bf16.mxu1 %vm1028_vm4, %v3744_v14 }
 0x214   : > { %2217 = vmatmul.mubr.bf16.gmra.mxu0 %v3747_v32 }
 0x215   : > { %1784 = vmatmul.mubr.bf16.gmra.mxu1 %v3747_v32  ;;  %3332 = vmatprep.mubr.msk.bf16.mxu0 %vm1028_vm4, %v3748_v19 }
 0x216   : > { %3271 = vmatprep.mubr.msk.bf16.mxu1 %vm1028_vm4, %v3748_v19 }
 0x21c   : > { %2225 = vmatmul.mubr.bf16.gmra.mxu0 %v3751_v11 }
 0x21d   : > { %1792 = vmatmul.mubr.bf16.gmra.mxu1 %v3751_v11  ;;  %3333 = vmatprep.mubr.msk.bf16.mxu0 %vm1028_vm4, %v3752_v39 }
 0x21e   : > { %3272 = vmatprep.mubr.msk.bf16.mxu1 %vm1028_vm4, %v3752_v39 }
 0x224   : > { %2233 = vmatmul.mubr.bf16.gmra.mxu0 %v3754_v34 }
 0x225   : > { %1800 = vmatmul.mubr.bf16.gmra.mxu1 %v3754_v34  ;;  %3334 = vmatprep.mubr.msk.bf16.mxu0 %vm1028_vm4, %v3756_v59 }
 0x226   : > { %3273 = vmatprep.mubr.msk.bf16.mxu1 %vm1028_vm4, %v3756_v59 }
 0x22c   : > { %2241 = vmatmul.mubr.bf16.gmra.mxu0 %v3758_v58 }
 0x22d   : > { %1808 = vmatmul.mubr.bf16.gmra.mxu1 %v3758_v58  ;;  %3335 = vmatprep.mubr.msk.bf16.mxu0 %vm1028_vm4, %v3759_v45 }
 0x22e   : > { %3274 = vmatprep.mubr.msk.bf16.mxu1 %vm1028_vm4, %v3759_v45 }
 0x234   : > { %2249 = vmatmul.mubr.bf16.gmra.mxu0 %v3762_v10 }
 0x235   : > { %1816 = vmatmul.mubr.bf16.gmra.mxu1 %v3762_v10  ;;  %3380 = vmatprep.mubr.msk.bf16.mxu0 %vm1028_vm4, %v4917_v20 }
 0x236   : > { %3275 = vmatprep.mubr.msk.bf16.mxu1 %vm1028_vm4, %v3763_v15 }
 0x23c   : > { %2612 = vmatmul.mubr.bf16.vlgmr.msra.gmra.mxu0 %v4961_v7 }
 0x23d   : > { %1824 = vmatmul.mubr.bf16.gmra.mxu1 %v3766_v36  ;;  %3381 = vmatprep.mubr.msk.bf16.mxu0 %vm1028_vm4, %v4970_v0 }
 0x23e   : > { %3385 = vmatprep.mubr.msk.bf16.mxu1 %vm1028_vm4, %v5134_v3 }
 0x244   : > { %2620 = vmatmul.mubr.bf16.gmra.mxu0 %v4999_v2 }
 0x245   : > { %2652 = vmatmul.mubr.bf16.vlgmr.msra.gmra.mxu1 %v5167_v49  ;;  %3382 = vmatprep.mubr.msk.bf16.mxu0 %vm1028_vm4, %v5005_v50 }
 0x246   : > { %3386 = vmatprep.mubr.msk.bf16.mxu1 %vm1028_vm4, %v5170_v40 }
 0x24c   : > { %2628 = vmatmul.mubr.bf16.gmra.mxu0 %v5040_v55 }
 0x24d   : > { %2660 = vmatmul.mubr.bf16.gmra.mxu1 %v3736_v24  ;;  %3383 = vmatprep.mubr.msk.bf16.mxu0 %vm1028_vm4, %v5053_v60  ;;  %v3767_v60 = vld [vmem:[#allocation2 + $0x114] ss:$8 sps:$4 sm:$0xff]  }
 0x24e   : > { %3387 = vmatprep.mubr.msk.bf16.mxu1 %vm1028_vm4, %v5178_v8 }
 0x254   : > { %2636 = vmatmul.mubr.bf16.gmra.mxu0 %v5079_v17 }
 0x255   : > { %2668 = vmatmul.mubr.bf16.gmra.mxu1 %v3739_v63  ;;  %3384 = vmatprep.mubr.msk.bf16.mxu0 %vm1028_vm4, %v5092_v54 }
 0x256   : > { %3388 = vmatprep.mubr.msk.bf16.mxu1 %vm1028_vm4, %v3741_v31 }
 0x25c   : > { %2644 = vmatmul.mubr.bf16.gmra.mxu0 %v5125_v44 }
 0x25d   : > { %2676 = vmatmul.mubr.bf16.gmra.mxu1 %v3743_v38 }
 0x25e   : > { %3389 = vmatprep.mubr.msk.bf16.mxu1 %vm1028_vm4, %v3744_v14 }
 0x265   : > { %2684 = vmatmul.mubr.bf16.gmra.mxu1 %v3747_v32 }
 0x266   : > { %3390 = vmatprep.mubr.msk.bf16.mxu1 %vm1028_vm4, %v3748_v19 }
 0x26d   : > { %2692 = vmatmul.mubr.bf16.gmra.mxu1 %v3751_v11 }
 0x26e   : > { %3391 = vmatprep.mubr.msk.bf16.mxu1 %vm1028_vm4, %v3752_v39 }
 0x275   : > { %2700 = vmatmul.mubr.bf16.gmra.mxu1 %v3754_v34 }
 0x276   : > { %3392 = vmatprep.mubr.msk.bf16.mxu1 %vm1028_vm4, %v3756_v59 }
 0x27d   : > { %2708 = vmatmul.mubr.bf16.gmra.mxu1 %v3758_v58 }
 0x27e   : > { %3393 = vmatprep.mubr.msk.bf16.mxu1 %vm1028_vm4, %v3759_v45 }
 0x284   : > { %v5229_v20 = vpop.f32.mrf.mxu1  ;;  %v2138_v7 = vpop.f32.mrf.mxu0 }
 0x285   : > { %2716 = vmatmul.mubr.bf16.gmra.mxu1 %v3762_v10 }
 0x286   : > { %3394 = vmatprep.mubr.msk.bf16.mxu1 %vm1028_vm4, %v3763_v15  ;;  %v1707_v0 = vpop.f32.mrf.mxu1  ;;  %v2140_v2 = vpop.f32.mrf.mxu0 }
 0x288   : > { %v5232_v50 = vpop.f32.mrf.mxu1  ;;  %v2141_v55 = vpop.f32.mrf.mxu0 }
 0x28a   : > { %v1710_v17 = vpop.f32.mrf.mxu1  ;;  %v2143_v54 = vpop.f32.mrf.mxu0 }
 0x28c   : > { %v1713_v33 = vpop.f32.mrf.mxu1  ;;  %v2146_v12 = vpop.f32.mrf.mxu0 }
 0x28d   : > { %2724 = vmatmul.mubr.bf16.gmra.mxu1 %v3766_v36  ;;  %v5234_v48 = vadd.f32 %v2138_v7, %v1713_v33 }
 0x28e   : > { %3395 = vmatprep.mubr.msk.bf16.mxu1 %vm1028_vm4, %v3767_v60  ;;  %v1715_v25 = vpop.f32.mrf.mxu1  ;;  %v2148_v18 = vpop.f32.mrf.mxu0 }
 0x290   : > { %v1716_v44 = vpop.f32.mrf.mxu1  ;;  %v2149_v13 = vpop.f32.mrf.mxu0 }
 0x291   : > { %v5237_v57 = vadd.f32 %v2141_v55, %v1716_v44 }
 0x292   : > { %v1718_v53 = vpop.f32.mrf.mxu1  ;;  %v2151_v22 = vpop.f32.mrf.mxu0 }
 0x294   : > { %v1721_v29 = vpop.f32.mrf.mxu1  ;;  %v2154_v3 = vpop.f32.mrf.mxu0 }
 0x295   : > { %2732 = vmatmul.mubr.bf16.gmra.mxu1 %v3769_v26  ;;  %v5239_v47 = vadd.f32 %v2146_v12, %v1721_v29 }
 0x296   : > { %v1723_v35 = vpop.f32.mrf.mxu1  ;;  %v2156_v37 = vpop.f32.mrf.mxu0 }
 0x298   : > { %v1724_v52 = vpop.f32.mrf.mxu1  ;;  %v2157_v16 = vpop.f32.mrf.mxu0 }
 0x299   : > { %v5241_v30 = vadd.f32 %v2149_v13, %v1724_v52 }
 0x29a   : > { %v1726_v42 = vpop.f32.mrf.mxu1  ;;  %v2159_v51 = vpop.f32.mrf.mxu0 }
 0x29c   : > { %v1729_v4 = vpop.f32.mrf.mxu1  ;;  %v2162_v9 = vpop.f32.mrf.mxu0 }
 0x29d   : > { %v5243_v23 = vadd.f32 %v2154_v3, %v1729_v4 }
 0x29e   : > { %v1731_v46 = vpop.f32.mrf.mxu1  ;;  %v2164_v61 = vpop.f32.mrf.mxu0 }
 0x2a0   : > { %v1732_v1 = vpop.f32.mrf.mxu1  ;;  %v2165_v41 = vpop.f32.mrf.mxu0 }
 0x2a1   : > { %v5245_v28 = vadd.f32 %v2157_v16, %v1732_v1 }
 0x2a2   : > { %v1734_v43 = vpop.f32.mrf.mxu1  ;;  %v2167_v27 = vpop.f32.mrf.mxu0 }
 0x2a4   : > { %v1737_v5 = vpop.f32.mrf.mxu1  ;;  %v2170_v49 = vpop.f32.mrf.mxu0 }
 0x2a5   : > { %v5247_v40 = vadd.f32 %v2162_v9, %v1737_v5 }
 0x2a6   : > { %v1739_v24 = vpop.f32.mrf.mxu1  ;;  %v2172_v8 = vpop.f32.mrf.mxu0 }
 0x2a8   : > { %v1740_v63 = vpop.f32.mrf.mxu1  ;;  %v2173_v31 = vpop.f32.mrf.mxu0 }
 0x2a9   : > { %v5249_v56 = vadd.f32 %v2165_v41, %v1740_v63 }
 0x2aa   : > { %v1742_v6 = vpop.f32.mrf.mxu1  ;;  %v2175_v38 = vpop.f32.mrf.mxu0 }
 0x2ac   : > { %v2178_v32 = vpop.f32.mrf.mxu0 }
 0x2ad   : > { %v1745_v14 = vpop.f32.mrf.mxu1 }
 0x2ae   : > { %v5251_v19 = vadd.f32 %v2170_v49, %v1745_v14  ;;  %v2180_v39 = vpop.f32.mrf.mxu0 }
 0x2af   : > { %v1747_v11 = vpop.f32.mrf.mxu1 }
 0x2b0   : > { %v2181_v59 = vpop.f32.mrf.mxu0 }
 0x2b1   : > { %v1748_v34 = vpop.f32.mrf.mxu1 }
 0x2b2   : > { %v5253_v58 = vadd.f32 %v2173_v31, %v1748_v34  ;;  %v2183_v10 = vpop.f32.mrf.mxu0 }
 0x2b3   : > { %v1750_v45 = vpop.f32.mrf.mxu1 }
 0x2b4   : > { %v2186_v36 = vpop.f32.mrf.mxu0 }
 0x2b5   : > { %v1753_v15 = vpop.f32.mrf.mxu1 }
 0x2b6   : > { %v5255_v7 = vadd.f32 %v2178_v32, %v1753_v15  ;;  %v2188_v2 = vpop.f32.mrf.mxu0 }
 0x2b7   : > { %v1755_v0 = vpop.f32.mrf.mxu1 }
 0x2b8   : > { %v2189_v60 = vpop.f32.mrf.mxu0 }
 0x2b9   : > { %v1756_v55 = vpop.f32.mrf.mxu1 }
 0x2ba   : > { %v5257_v17 = vadd.f32 %v2181_v59, %v1756_v55  ;;  %v2191_v33 = vpop.f32.mrf.mxu0 }
 0x2bb   : > { %v1758_v54 = vpop.f32.mrf.mxu1 }
 0x2bc   : > { %v2194_v25 = vpop.f32.mrf.mxu0 }
 0x2bd   : > { %v1761_v12 = vpop.f32.mrf.mxu1 }
 0x2be   : > { %v5259_v18 = vadd.f32 %v2186_v36, %v1761_v12  ;;  %v2196_v13 = vpop.f32.mrf.mxu0 }
 0x2bf   : > { %v1763_v44 = vpop.f32.mrf.mxu1 }
 0x2c0   : > { %v2197_v53 = vpop.f32.mrf.mxu0 }
 0x2c1   : > { %v1764_v26 = vpop.f32.mrf.mxu1 }
 0x2c2   : > { %v5261_v22 = vadd.f32 %v2189_v60, %v1764_v26  ;;  %v2199_v3 = vpop.f32.mrf.mxu0 }
 0x2c3   : > { %v1766_v29 = vpop.f32.mrf.mxu1 }
 0x2c4   : > { %v2202_v37 = vpop.f32.mrf.mxu0 }
 0x2c5   : > { %v1769_v35 = vpop.f32.mrf.mxu1 }
 0x2c6   : > { %v5263_v52 = vadd.f32 %v2194_v25, %v1769_v35  ;;  %v2204_v42 = vpop.f32.mrf.mxu0 }
 0x2c7   : > { %v1771_v16 = vpop.f32.mrf.mxu1 }
 0x2c8   : > { %v2205_v4 = vpop.f32.mrf.mxu0 }
 0x2c9   : > { %v1772_v51 = vpop.f32.mrf.mxu1 }
 0x2ca   : > { %v5265_v9 = vadd.f32 %v2197_v53, %v1772_v51  ;;  %v2207_v61 = vpop.f32.mrf.mxu0 }
 0x2cb   : > { %v1774_v46 = vpop.f32.mrf.mxu1 }
 0x2cc   : > { %v2210_v41 = vpop.f32.mrf.mxu0 }
 0x2cd   : > { %v1777_v1 = vpop.f32.mrf.mxu1 }
 0x2ce   : > { %v5267_v43 = vadd.f32 %v2202_v37, %v1777_v1  ;;  %v2212_v5 = vpop.f32.mrf.mxu0 }
 0x2cf   : > { %v1779_v27 = vpop.f32.mrf.mxu1 }
 0x2d0   : > { %v2213_v24 = vpop.f32.mrf.mxu0 }
 0x2d1   : > { %v1780_v49 = vpop.f32.mrf.mxu1 }
 0x2d2   : > { %v5269_v8 = vadd.f32 %v2205_v4, %v1780_v49  ;;  %v2215_v31 = vpop.f32.mrf.mxu0 }
 0x2d3   : > { %v1782_v63 = vpop.f32.mrf.mxu1 }
 0x2d4   : > { %v2218_v38 = vpop.f32.mrf.mxu0 }
 0x2d5   : > { %v1785_v6 = vpop.f32.mrf.mxu1 }
 0x2d6   : > { %v5271_v14 = vadd.f32 %v2210_v41, %v1785_v6  ;;  %v2220_v11 = vpop.f32.mrf.mxu0 }
 0x2d7   : > { %v1787_v32 = vpop.f32.mrf.mxu1 }
 0x2d8   : > { %v2221_v34 = vpop.f32.mrf.mxu0 }
 0x2d9   : > { %v1788_v39 = vpop.f32.mrf.mxu1 }
 0x2da   : > { %v5273_v59 = vadd.f32 %v2213_v24, %v1788_v39  ;;  %v2223_v10 = vpop.f32.mrf.mxu0 }
 0x2db   : > { %v1790_v45 = vpop.f32.mrf.mxu1 }
 0x2dc   : > { %v2226_v36 = vpop.f32.mrf.mxu0 }
 0x2dd   : > { %v1793_v15 = vpop.f32.mrf.mxu1 }
 0x2de   : > { %v5275_v0 = vadd.f32 %v2218_v38, %v1793_v15  ;;  %v2228_v55 = vpop.f32.mrf.mxu0  ;;  %v2131_v15 = vadd.f32 %v5184_v62, %v5229_v20 }
 0x2df   : > { %v1795_v2 = vpop.f32.mrf.mxu1  ;;  %v5296_v55 = vld [vmem:[%s5488_s4] ss:$0 sm:$0xff] }
 0x2e0   : > { %v2229_v54 = vpop.f32.mrf.mxu0 }
 0x2e1   : > { %v1796_v60 = vpop.f32.mrf.mxu1 }
 0x2e2   : > { %v5277_v33 = vadd.f32 %v2221_v34, %v1796_v60  ;;  %v2231_v25 = vpop.f32.mrf.mxu0 }
 0x2e3   : > { %v1798_v12 = vpop.f32.mrf.mxu1 }
 0x2e4   : > { %v2234_v13 = vpop.f32.mrf.mxu0 }
 0x2e5   : > { %v1801_v44 = vpop.f32.mrf.mxu1 }
 0x2e6   : > { %v5279_v26 = vadd.f32 %v2226_v36, %v1801_v44  ;;  %v2236_v29 = vpop.f32.mrf.mxu0  ;;  %v2134_v44 = vadd.f32 %v5188_v21, %v5232_v50 }
 0x2e7   : > { %v1803_v53 = vpop.f32.mrf.mxu1 }
 0x2e8   : > { %v2237_v35 = vpop.f32.mrf.mxu0 }
 0x2e9   : > { %v1804_v3 = vpop.f32.mrf.mxu1 }
 0x2ea   : > { %v5281_v37 = vadd.f32 %v2229_v54, %v1804_v3  ;;  %v2239_v42 = vpop.f32.mrf.mxu0 }
 0x2eb   : > { %v1806_v16 = vpop.f32.mrf.mxu1 }
 0x2ec   : > { %v2242_v4 = vpop.f32.mrf.mxu0 }
 0x2ed   : > { %v1809_v51 = vpop.f32.mrf.mxu1 }
 0x2ee   : > { %v5283_v46 = vadd.f32 %v2234_v13, %v1809_v51  ;;  %v2244_v1 = vpop.f32.mrf.mxu0 }
 0x2ef   : > { %v1811_v61 = vpop.f32.mrf.mxu1 }
 0x2f0   : > { %v2245_v27 = vpop.f32.mrf.mxu0 }
 0x2f1   : > { %v1812_v41 = vpop.f32.mrf.mxu1 }
 0x2f2   : > { %v5285_v5 = vadd.f32 %v2237_v35, %v1812_v41  ;;  %v2247_v24 = vpop.f32.mrf.mxu0 }
 0x2f3   : > { %v1814_v49 = vpop.f32.mrf.mxu1 }
 0x2f4   : > { %v2250_v31 = vpop.f32.mrf.mxu0 }
 0x2f5   : > { %v1817_v63 = vpop.f32.mrf.mxu1 }
 0x2f6   : > { %v5287_v6 = vadd.f32 %v2242_v4, %v1817_v63  ;;  %v2252_v32 = vpop.f32.mrf.mxu0 }
 0x2f7   : > { %v1819_v38 = vpop.f32.mrf.mxu1  ;;  %v2971_v32 = vld [vmem:[%s4057_s17] sm:$0xff] }
 0x2f8   : > { %v2253_v39 = vpop.f32.mrf.mxu0 }
 0x2f9   : > { %v1820_v11 = vpop.f32.mrf.mxu1 }
 0x2fa   : > { %v5289_v34 = vadd.f32 %v2245_v27, %v1820_v11  ;;  %v2255_v10 = vpop.f32.mrf.mxu0 }
 0x2fb   : > { %v1822_v45 = vpop.f32.mrf.mxu1 }
 0x2fc   : > { %v2613_v2 = vpop.f32.mrf.mxu0 }
 0x2fd   : > { %v1825_v36 = vpop.f32.mrf.mxu1  ;;  %v2740_v54 = vadd.f32 %v2613_v2, %v2131_v15 }
 0x2fe   : > { %v5298_v60 = vadd.f32 %v2250_v31, %v1825_v36  ;;  %v2615_v25 = vpop.f32.mrf.mxu0 }
 0x2ff   : > { %v1827_v12 = vpop.f32.mrf.mxu1  ;;  %v2779_v13 = vadd.f32 %v5296_v55, %v2740_v54 }
 0x300   : > { %v2616_v29 = vpop.f32.mrf.mxu0 }
 0x301   : > { %v1828_v53 = vpop.f32.mrf.mxu1  ;;  %v2811_v62 = vadd.f32 3.0, %v2779_v13  ;;  %v2741_v3 = vadd.f32 %v2616_v29, %v2134_v44 }
 0x302   : > { %v5303_v20 = vadd.f32 %v2253_v39, %v1828_v53  ;;  %v2618_v16 = vpop.f32.mrf.mxu0  ;;  %v2972_v53 = vld [vmem:[%s4057_s17 + $0x8] sm:$0xff] }
 0x303   : > { %v1830_v35 = vpop.f32.mrf.mxu1  ;;  %v2843_v42 = vmax.f32 %v2811_v62, 0.0  ;;  %v2780_v51 = vadd.f32 %v5296_v55, %v2741_v3 }
 0x304   : > { %v2621_v4 = vpop.f32.mrf.mxu0 }
 0x305   : > { %v2653_v61 = vpop.f32.mrf.mxu1  ;;  %v2875_v1 = vmin.f32 %v2843_v42, 6.0  ;;  %v2812_v41 = vadd.f32 3.0, %v2780_v51  ;;  %v2742_v21 = vadd.f32 %v2621_v4, %v5234_v48 }
 0x306   : > { %v2750_v50 = vadd.f32 %v2653_v61, %v5251_v19  ;;  %v2623_v27 = vpop.f32.mrf.mxu0 }
 0x307   : > { %v2655_v49 = vpop.f32.mrf.mxu1  ;;  %v2907_v24 = vmul.f32 %v2875_v1, %v2779_v13  ;;  %v2844_v63 = vmax.f32 %v2812_v41, 0.0  ;;  %v2781_v31 = vadd.f32 %v5296_v55, %v2742_v21 }
 0x308   : > { %v2789_v38 = vadd.f32 %v5296_v55, %v2750_v50  ;;  %v2624_v11 = vpop.f32.mrf.mxu0 }
 0x309   : > { %v2656_v39 = vpop.f32.mrf.mxu1  ;;  %v2939_v45 = vmul.f32 0.16666667, %v2907_v24  ;;  %v2876_v10 = vmin.f32 %v2844_v63, 6.0  ;;  %v2813_v15 = vadd.f32 3.0, %v2781_v31  ;;  %v2743_v48 = vadd.f32 %v2624_v11, %v5237_v57  ;;  %v2973_v24 = vld [vmem:[%s4057_s17 + $0x10] sm:$0xff] }
 0x30a   : > { %v2821_v36 = vadd.f32 3.0, %v2789_v38  ;;  %v2751_v19 = vadd.f32 %v2656_v39, %v5253_v58  ;;  %v2626_v2 = vpop.f32.mrf.mxu0  ;;  %v2981_v63 = vld [vmem:[%s4057_s17 + $0x50] sm:$0xff] }
 0x30b   : > { %v2658_v54 = vpop.f32.mrf.mxu1  ;;  %v3003_v12 = vadd.f32 %v2971_v32, %v2939_v45  ;;  %v2908_v25 = vmul.f32 %v2876_v10, %v2780_v51  ;;  %v2845_v44 = vmax.f32 %v2813_v15, 0.0  ;;  %v2782_v29 = vadd.f32 %v5296_v55, %v2743_v48 }
 0x30c   : > { %v2853_v13 = vmax.f32 %v2821_v36, 0.0  ;;  %v2790_v62 = vadd.f32 %v5296_v55, %v2751_v19  ;;  %v2629_v3 = vpop.f32.mrf.mxu0 }
 0x30d   : > { %v2661_v35 = vpop.f32.mrf.mxu1  ;;  %3035 = vst [vmem:[%s5318_s27] sm:$0xff] %v3003_v12  ;;  %v2940_v57 = vmul.f32 0.16666667, %v2908_v25  ;;  %v2877_v58 = vmin.f32 %v2845_v44, 6.0  ;;  %v2744_v42 = vadd.f32 %v2629_v3, %v5239_v47  ;;  %v2814_v51 = vadd.f32 3.0, %v2782_v29 }
 0x30e   : > { %v2885_v16 = vmin.f32 %v2853_v13, 6.0  ;;  %v2822_v4 = vadd.f32 3.0, %v2790_v62  ;;  %v2752_v61 = vadd.f32 %v2661_v35, %v5255_v7  ;;  %v2631_v1 = vpop.f32.mrf.mxu0 }
 0x30f   : > { %v2663_v41 = vpop.f32.mrf.mxu1  ;;  %v3004_v21 = vadd.f32 %v2972_v53, %v2940_v57  ;;  %v2909_v50 = vmul.f32 %v2877_v58, %v2781_v31  ;;  %v2783_v49 = vadd.f32 %v5296_v55, %v2744_v42  ;;  %v2846_v32 = vmax.f32 %v2814_v51, 0.0  ;;  %v2982_v42 = vld [vmem:[%s4057_s17 + $0x58] sm:$0xff] }
 0x310   : > { %v2917_v27 = vmul.f32 %v2885_v16, %v2789_v38  ;;  %v2854_v11 = vmax.f32 %v2822_v4, 0.0  ;;  %v2791_v39 = vadd.f32 %v5296_v55, %v2752_v61  ;;  %v2632_v45 = vpop.f32.mrf.mxu0  ;;  %v2974_v16 = vld [vmem:[%s4057_s17 + $0x18] sm:$0xff] }
 0x311   : > { %v2664_v47 = vpop.f32.mrf.mxu1  ;;  %3036 = vst [vmem:[%s5318_s27 + $0x8] sm:$0xff] %v3004_v21  ;;  %v2941_v10 = vmul.f32 0.16666667, %v2909_v50  ;;  %v2815_v36 = vadd.f32 3.0, %v2783_v49  ;;  %v2745_v7 = vadd.f32 %v2632_v45, %v5241_v30  ;;  %v2878_v48 = vmin.f32 %v2846_v32, 6.0 }
 0x312   : > { %v2949_v15 = vmul.f32 0.16666667, %v2917_v27  ;;  %v2886_v31 = vmin.f32 %v2854_v11, 6.0  ;;  %v2823_v38 = vadd.f32 3.0, %v2791_v39  ;;  %v2753_v19 = vadd.f32 %v2664_v47, %v5257_v17  ;;  %v2634_v2 = vpop.f32.mrf.mxu0 }
 0x313   : > { %v2666_v54 = vpop.f32.mrf.mxu1  ;;  %v3005_v12 = vadd.f32 %v2973_v24, %v2941_v10  ;;  %v2847_v44 = vmax.f32 %v2815_v36, 0.0  ;;  %v2784_v13 = vadd.f32 %v5296_v55, %v2745_v7  ;;  %v2910_v53 = vmul.f32 %v2878_v48, %v2782_v29  ;;  %v2983_v7 = vld [vmem:[%s4057_s17 + $0x60] sm:$0xff] }
 0x314   : > { %v3013_v25 = vadd.f32 %v2981_v63, %v2949_v15  ;;  %v2918_v3 = vmul.f32 %v2886_v31, %v2790_v62  ;;  %v2855_v35 = vmax.f32 %v2823_v38, 0.0  ;;  %v2792_v30 = vadd.f32 %v5296_v55, %v2753_v19  ;;  %v2637_v57 = vpop.f32.mrf.mxu0 }
 0x315   : > { %v2669_v58 = vpop.f32.mrf.mxu1  ;;  %3037 = vst [vmem:[%s5318_s27 + $0x10] sm:$0xff] %v3005_v12  ;;  %v2879_v17 = vmin.f32 %v2847_v44, 6.0  ;;  %v2816_v51 = vadd.f32 3.0, %v2784_v13  ;;  %v2746_v4 = vadd.f32 %v2637_v57, %v5243_v23  ;;  %v2942_v1 = vmul.f32 0.16666667, %v2910_v53  ;;  %v2975_v23 = vld [vmem:[%s4057_s17 + $0x20] sm:$0xff] }
 0x316   : > { %3045 = vst [vmem:[%s5318_s27 + $0x50] sm:$0xff] %v3013_v25  ;;  %v2754_v61 = vadd.f32 %v2669_v58, %v5259_v18  ;;  %v2950_v41 = vmul.f32 0.16666667, %v2918_v3  ;;  %v2887_v29 = vmin.f32 %v2855_v35, 6.0  ;;  %v2824_v62 = vadd.f32 3.0, %v2792_v30  ;;  %v2639_v21 = vpop.f32.mrf.mxu0  ;;  %v2976_v57 = vld [vmem:[%s4057_s17 + $0x28] sm:$0xff] }
 0x317   : > { %v2671_v50 = vpop.f32.mrf.mxu1  ;;  %v2911_v27 = vmul.f32 %v2879_v17, %v2783_v49  ;;  %v2848_v24 = vmax.f32 %v2816_v51, 0.0  ;;  %v2785_v63 = vadd.f32 %v5296_v55, %v2746_v4  ;;  %v3006_v11 = vadd.f32 %v2974_v16, %v2942_v1 }
 0x318   : > { %v2793_v32 = vadd.f32 %v5296_v55, %v2754_v61  ;;  %v3014_v45 = vadd.f32 %v2982_v42, %v2950_v41  ;;  %v2919_v47 = vmul.f32 %v2887_v29, %v2791_v39  ;;  %v2856_v18 = vmax.f32 %v2824_v62, 0.0  ;;  %v2640_v10 = vpop.f32.mrf.mxu0 }
 0x319   : > { %v2672_v15 = vpop.f32.mrf.mxu1  ;;  %v2943_v36 = vmul.f32 0.16666667, %v2911_v27  ;;  %v2880_v48 = vmin.f32 %v2848_v24, 6.0  ;;  %v2817_v31 = vadd.f32 3.0, %v2785_v63  ;;  %3038 = vst [vmem:[%s5318_s27 + $0x18] sm:$0xff] %v3006_v11  ;;  %v2747_v2 = vadd.f32 %v2640_v10, %v5245_v28 }
 0x31a   : > { %v2825_v49 = vadd.f32 3.0, %v2793_v32  ;;  %3046 = vst [vmem:[%s5318_s27 + $0x58] sm:$0xff] %v3014_v45  ;;  %v2951_v38 = vmul.f32 0.16666667, %v2919_v47  ;;  %v2888_v19 = vmin.f32 %v2856_v18, 6.0  ;;  %v2755_v54 = vadd.f32 %v2672_v15, %v5261_v22  ;;  %v2642_v39 = vpop.f32.mrf.mxu0  ;;  %v2984_v22 = vld [vmem:[%s4057_s17 + $0x68] sm:$0xff] }
 0x31b   : > { %v2674_v12 = vpop.f32.mrf.mxu1  ;;  %v3007_v25 = vadd.f32 %v2975_v23, %v2943_v36  ;;  %v2912_v44 = vmul.f32 %v2880_v48, %v2784_v13  ;;  %v2849_v53 = vmax.f32 %v2817_v31, 0.0  ;;  %v2786_v16 = vadd.f32 %v5296_v55, %v2747_v2  ;;  %v2977_v23 = vld [vmem:[%s4057_s17 + $0x30] sm:$0xff] }
 0x31c   : > { %v2857_v3 = vmax.f32 %v2825_v49, 0.0  ;;  %v3015_v35 = vadd.f32 %v2983_v7, %v2951_v38  ;;  %v2920_v58 = vmul.f32 %v2888_v19, %v2792_v30  ;;  %v2794_v42 = vadd.f32 %v5296_v55, %v2755_v54  ;;  %v2645_v17 = vpop.f32.mrf.mxu0  ;;  %v2985_v47 = vld [vmem:[%s4057_s17 + $0x70] sm:$0xff] }
 0x31d   : > { %v2677_v51 = vpop.f32.mrf.mxu1  ;;  %3039 = vst [vmem:[%s5318_s27 + $0x20] sm:$0xff] %v3007_v25  ;;  %v2944_v28 = vmul.f32 0.16666667, %v2912_v44  ;;  %v2881_v4 = vmin.f32 %v2849_v53, 6.0  ;;  %v2748_v13 = vadd.f32 %v2645_v17, %v5247_v40  ;;  %v2818_v41 = vadd.f32 3.0, %v2786_v16 }
 0x31e   : > { %v2889_v61 = vmin.f32 %v2857_v3, 6.0  ;;  %3047 = vst [vmem:[%s5318_s27 + $0x60] sm:$0xff] %v3015_v35  ;;  %v2952_v1 = vmul.f32 0.16666667, %v2920_v58  ;;  %v2826_v29 = vadd.f32 3.0, %v2794_v42  ;;  %v2756_v30 = vadd.f32 %v2677_v51, %v5263_v52  ;;  %v2647_v62 = vpop.f32.mrf.mxu0  ;;  %v2986_v58 = vld [vmem:[%s4057_s17 + $0x78] sm:$0xff] }
 0x31f   : > { %v2679_v21 = vpop.f32.mrf.mxu1  ;;  %v3008_v50 = vadd.f32 %v2976_v57, %v2944_v28  ;;  %v2913_v27 = vmul.f32 %v2881_v4, %v2785_v63  ;;  %v2787_v11 = vadd.f32 %v5296_v55, %v2748_v13  ;;  %v2850_v18 = vmax.f32 %v2818_v41, 0.0  ;;  %v2978_v57 = vld [vmem:[%s4057_s17 + $0x38] sm:$0xff] }
 0x320   : > { %v2921_v24 = vmul.f32 %v2889_v61, %v2793_v32  ;;  %v3016_v45 = vadd.f32 %v2984_v22, %v2952_v1  ;;  %v2858_v40 = vmax.f32 %v2826_v29, 0.0  ;;  %v2795_v10 = vadd.f32 %v5296_v55, %v2756_v30  ;;  %v2648_v15 = vpop.f32.mrf.mxu0  ;;  %v2979_v30 = vld [vmem:[%s4057_s17 + $0x40] sm:$0xff] }
 0x321   : > { %v2680_v36 = vpop.f32.mrf.mxu1  ;;  %3040 = vst [vmem:[%s5318_s27 + $0x28] sm:$0xff] %v3008_v50  ;;  %v2945_v7 = vmul.f32 0.16666667, %v2913_v27  ;;  %v2819_v48 = vadd.f32 3.0, %v2787_v11  ;;  %v2749_v31 = vadd.f32 %v2648_v15, %v5249_v56  ;;  %v2882_v63 = vmin.f32 %v2850_v18, 6.0  ;;  %v2987_v27 = vld [vmem:[%s4057_s17 + $0x80] sm:$0xff] }
 0x322   : > { %v2953_v52 = vmul.f32 0.16666667, %v2921_v24  ;;  %3048 = vst [vmem:[%s5318_s27 + $0x68] sm:$0xff] %v3016_v45  ;;  %v2890_v32 = vmin.f32 %v2858_v40, 6.0  ;;  %v2827_v49 = vadd.f32 3.0, %v2795_v10  ;;  %v2757_v38 = vadd.f32 %v2680_v36, %v5265_v9  ;;  %v2650_v19 = vpop.f32.mrf.mxu0 }
 0x323   : > { %v2682_v2 = vpop.f32.mrf.mxu1  ;;  %v3009_v54 = vadd.f32 %v2977_v23, %v2945_v7  ;;  %v2851_v12 = vmax.f32 %v2819_v48, 0.0  ;;  %v2788_v25 = vadd.f32 %v5296_v55, %v2749_v31  ;;  %v2914_v44 = vmul.f32 %v2882_v63, %v2786_v16  ;;  %v2988_v63 = vld [vmem:[%s4057_s17 + $0x88] sm:$0xff] }
 0x324   : > { %v3017_v39 = vadd.f32 %v2985_v47, %v2953_v52  ;;  %v2922_v53 = vmul.f32 %v2890_v32, %v2794_v42  ;;  %v2859_v56 = vmax.f32 %v2827_v49, 0.0  ;;  %v2796_v3 = vadd.f32 %v5296_v55, %v2757_v38  ;;  %v2980_v52 = vld [vmem:[%s4057_s17 + $0x48] sm:$0xff] }
 0x325   : > { %v2685_v35 = vpop.f32.mrf.mxu1  ;;  %3041 = vst [vmem:[%s5318_s27 + $0x30] sm:$0xff] %v3009_v54  ;;  %v2883_v17 = vmin.f32 %v2851_v12, 6.0  ;;  %v2820_v9 = vadd.f32 3.0, %v2788_v25  ;;  %v2946_v28 = vmul.f32 0.16666667, %v2914_v44 }
 0x326   : > { %3049 = vst [vmem:[%s5318_s27 + $0x70] sm:$0xff] %v3017_v39  ;;  %v2758_v51 = vadd.f32 %v2685_v35, %v5267_v43  ;;  %v2954_v22 = vmul.f32 0.16666667, %v2922_v53  ;;  %v2891_v4 = vmin.f32 %v2859_v56, 6.0  ;;  %v2828_v61 = vadd.f32 3.0, %v2796_v3  ;;  %v2989_v53 = vld [vmem:[%s4057_s17 + $0x90] sm:$0xff] }
 0x327   : > { %v2687_v16 = vpop.f32.mrf.mxu1  ;;  %v2915_v42 = vmul.f32 %v2883_v17, %v2787_v11  ;;  %v2852_v13 = vmax.f32 %v2820_v9, 0.0  ;;  %v3010_v41 = vadd.f32 %v2978_v57, %v2946_v28 }
 0x328   : > { %v2797_v1 = vadd.f32 %v5296_v55, %v2758_v51  ;;  %v3018_v29 = vadd.f32 %v2986_v58, %v2954_v22  ;;  %v2923_v62 = vmul.f32 %v2891_v4, %v2795_v10  ;;  %v2860_v21 = vmax.f32 %v2828_v61, 0.0  ;;  %v2990_v22 = vld [vmem:[%s4057_s17 + $0x98] sm:$0xff] }
 0x329   : > { %v2688_v50 = vpop.f32.mrf.mxu1  ;;  %v2947_v43 = vmul.f32 0.16666667, %v2915_v42  ;;  %v2884_v24 = vmin.f32 %v2852_v13, 6.0  ;;  %3042 = vst [vmem:[%s5318_s27 + $0x38] sm:$0xff] %v3010_v41 }
 0x32a   : > { %v2829_v45 = vadd.f32 3.0, %v2797_v1  ;;  %v2759_v23 = vadd.f32 %v2688_v50, %v5269_v8  ;;  %3050 = vst [vmem:[%s5318_s27 + $0x78] sm:$0xff] %v3018_v29  ;;  %v2955_v11 = vmul.f32 0.16666667, %v2923_v62  ;;  %v2892_v47 = vmin.f32 %v2860_v21, 6.0  ;;  %v2991_v62 = vld [vmem:[%s4057_s17 + $0xa0] sm:$0xff] }
 0x32b   : > { %v2690_v18 = vpop.f32.mrf.mxu1  ;;  %v3011_v40 = vadd.f32 %v2979_v30, %v2947_v43  ;;  %v2916_v15 = vmul.f32 %v2884_v24, %v2788_v25 }
 0x32c   : > { %v2861_v10 = vmax.f32 %v2829_v45, 0.0  ;;  %v2798_v36 = vadd.f32 %v5296_v55, %v2759_v23  ;;  %v3019_v7 = vadd.f32 %v2987_v27, %v2955_v11  ;;  %v2924_v48 = vmul.f32 %v2892_v47, %v2796_v3  ;;  %v2992_v18 = vld [vmem:[%s4057_s17 + $0xa8] sm:$0xff] }
 0x32d   : > { %v2693_v31 = vpop.f32.mrf.mxu1  ;;  %3043 = vst [vmem:[%s5318_s27 + $0x40] sm:$0xff] %v3011_v40  ;;  %v2948_v8 = vmul.f32 0.16666667, %v2916_v15 }
 0x32e   : > { %v2893_v32 = vmin.f32 %v2861_v10, 6.0  ;;  %v2830_v49 = vadd.f32 3.0, %v2798_v36  ;;  %v2760_v38 = vadd.f32 %v2693_v31, %v5271_v14  ;;  %3051 = vst [vmem:[%s5318_s27 + $0x80] sm:$0xff] %v3019_v7  ;;  %v2956_v19 = vmul.f32 0.16666667, %v2924_v48 }
 0x32f   : > { %v2695_v2 = vpop.f32.mrf.mxu1  ;;  %v3012_v54 = vadd.f32 %v2980_v52, %v2948_v8 }
 0x330   : > { %v2925_v39 = vmul.f32 %v2893_v32, %v2797_v1  ;;  %v2862_v12 = vmax.f32 %v2830_v49, 0.0  ;;  %v2799_v25 = vadd.f32 %v5296_v55, %v2760_v38  ;;  %v3020_v44 = vadd.f32 %v2988_v63, %v2956_v19  ;;  %v2993_v63 = vld [vmem:[%s4057_s17 + $0xb0] sm:$0xff] }
 0x331   : > { %v2696_v56 = vpop.f32.mrf.mxu1  ;;  %3044 = vst [vmem:[%s5318_s27 + $0x48] sm:$0xff] %v3012_v54 }
 0x332   : > { %v2957_v3 = vmul.f32 0.16666667, %v2925_v39  ;;  %v2894_v35 = vmin.f32 %v2862_v12, 6.0  ;;  %v2831_v57 = vadd.f32 3.0, %v2799_v25  ;;  %v2761_v14 = vadd.f32 %v2696_v56, %v5273_v59  ;;  %3052 = vst [vmem:[%s5318_s27 + $0x88] sm:$0xff] %v3020_v44  ;;  %v2994_v44 = vld [vmem:[%s4057_s17 + $0xb8] sm:$0xff] }
 0x333   : > { %v2698_v58 = vpop.f32.mrf.mxu1 }
 0x334   : > { %v3021_v17 = vadd.f32 %v2989_v53, %v2957_v3  ;;  %v2926_v9 = vmul.f32 %v2894_v35, %v2798_v36  ;;  %v2863_v51 = vmax.f32 %v2831_v57, 0.0  ;;  %v2800_v28 = vadd.f32 %v5296_v55, %v2761_v14 }
 0x335   : > { %v2701_v4 = vpop.f32.mrf.mxu1 }
 0x336   : > { %3053 = vst [vmem:[%s5318_s27 + $0x90] sm:$0xff] %v3021_v17  ;;  %v2958_v61 = vmul.f32 0.16666667, %v2926_v9  ;;  %v2895_v16 = vmin.f32 %v2863_v51, 6.0  ;;  %v2832_v42 = vadd.f32 3.0, %v2800_v28  ;;  %v2762_v13 = vadd.f32 %v2701_v4, %v5275_v0  ;;  %v2995_v51 = vld [vmem:[%s4057_s17 + $0xc0] sm:$0xff] }
 0x337   : > { %v2703_v1 = vpop.f32.mrf.mxu1 }
 0x338   : > { %v3022_v41 = vadd.f32 %v2990_v22, %v2958_v61  ;;  %v2927_v59 = vmul.f32 %v2895_v16, %v2799_v25  ;;  %v2864_v29 = vmax.f32 %v2832_v42, 0.0  ;;  %v2801_v30 = vadd.f32 %v5296_v55, %v2762_v13 }
 0x339   : > { %v2704_v21 = vpop.f32.mrf.mxu1 }
 0x33a   : > { %3054 = vst [vmem:[%s5318_s27 + $0x98] sm:$0xff] %v3022_v41  ;;  %v2959_v50 = vmul.f32 0.16666667, %v2927_v59  ;;  %v2896_v43 = vmin.f32 %v2864_v29, 6.0  ;;  %v2833_v27 = vadd.f32 3.0, %v2801_v30  ;;  %v2763_v24 = vadd.f32 %v2704_v21, %v5277_v33  ;;  %v2996_v59 = vld [vmem:[%s4057_s17 + $0xc8] sm:$0xff] }
 0x33b   : > { %v2706_v45 = vpop.f32.mrf.mxu1 }
 0x33c   : > { %v3023_v23 = vadd.f32 %v2991_v62, %v2959_v50  ;;  %v2928_v0 = vmul.f32 %v2896_v43, %v2800_v28  ;;  %v2865_v11 = vmax.f32 %v2833_v27, 0.0  ;;  %v2802_v47 = vadd.f32 %v5296_v55, %v2763_v24 }
 0x33d   : > { %v2709_v40 = vpop.f32.mrf.mxu1 }
 0x33e   : > { %3055 = vst [vmem:[%s5318_s27 + $0xa0] sm:$0xff] %v3023_v23  ;;  %v2960_v15 = vmul.f32 0.16666667, %v2928_v0  ;;  %v2897_v10 = vmin.f32 %v2865_v11, 6.0  ;;  %v2834_v36 = vadd.f32 3.0, %v2802_v47  ;;  %v2764_v7 = vadd.f32 %v2709_v40, %v5279_v26  ;;  %v2997_v23 = vld [vmem:[%s4057_s17 + $0xd0] sm:$0xff] }
 0x33f   : > { %v2711_v52 = vpop.f32.mrf.mxu1 }
 0x340   : > { %v3024_v48 = vadd.f32 %v2992_v18, %v2960_v15  ;;  %v2929_v33 = vmul.f32 %v2897_v10, %v2801_v30  ;;  %v2866_v31 = vmax.f32 %v2834_v36, 0.0  ;;  %v2803_v8 = vadd.f32 %v5296_v55, %v2764_v7  ;;  %v2998_v52 = vld [vmem:[%s4057_s17 + $0xd8] sm:$0xff] }
 0x341   : > { %v2712_v32 = vpop.f32.mrf.mxu1 }
 0x342   : > { %3056 = vst [vmem:[%s5318_s27 + $0xa8] sm:$0xff] %v3024_v48  ;;  %v2961_v49 = vmul.f32 0.16666667, %v2929_v33  ;;  %v2898_v38 = vmin.f32 %v2866_v31, 6.0  ;;  %v2835_v19 = vadd.f32 3.0, %v2803_v8  ;;  %v2765_v2 = vadd.f32 %v2712_v32, %v5281_v37 }
 0x343   : > { %v2714_v54 = vpop.f32.mrf.mxu1 }
 0x344   : > { %v3025_v39 = vadd.f32 %v2993_v63, %v2961_v49  ;;  %v2930_v26 = vmul.f32 %v2898_v38, %v2802_v47  ;;  %v2867_v12 = vmax.f32 %v2835_v19, 0.0  ;;  %v2804_v25 = vadd.f32 %v5296_v55, %v2765_v2  ;;  %v2999_v2 = vld [vmem:[%s4057_s17 + $0xe0] sm:$0xff] }
 0x345   : > { %v2717_v53 = vpop.f32.mrf.mxu1 }
 0x346   : > { %3057 = vst [vmem:[%s5318_s27 + $0xb0] sm:$0xff] %v3025_v39  ;;  %v2962_v56 = vmul.f32 0.16666667, %v2930_v26  ;;  %v2899_v3 = vmin.f32 %v2867_v12, 6.0  ;;  %v2836_v35 = vadd.f32 3.0, %v2804_v25  ;;  %v2766_v57 = vadd.f32 %v2717_v53, %v5283_v46 }
 0x347   : > { %v2719_v14 = vpop.f32.mrf.mxu1 }
 0x348   : > { %v3026_v58 = vadd.f32 %v2994_v44, %v2962_v56  ;;  %v2931_v37 = vmul.f32 %v2899_v3, %v2803_v8  ;;  %v2868_v17 = vmax.f32 %v2836_v35, 0.0  ;;  %v2805_v9 = vadd.f32 %v5296_v55, %v2766_v57  ;;  %v3000_v35 = vld [vmem:[%s4057_s17 + $0xe8] sm:$0xff] }
 0x349   : > { %v2720_v28 = vpop.f32.mrf.mxu1 }
 0x34a   : > { %3058 = vst [vmem:[%s5318_s27 + $0xb8] sm:$0xff] %v3026_v58  ;;  %v2963_v22 = vmul.f32 0.16666667, %v2931_v37  ;;  %v2900_v4 = vmin.f32 %v2868_v17, 6.0  ;;  %v2837_v61 = vadd.f32 3.0, %v2805_v9  ;;  %v2767_v16 = vadd.f32 %v2720_v28, %v5285_v5 }
 0x34b   : > { %v2722_v42 = vpop.f32.mrf.mxu1 }
 0x34c   : > { %v3027_v13 = vadd.f32 %v2995_v51, %v2963_v22  ;;  %v2932_v46 = vmul.f32 %v2900_v4, %v2804_v25  ;;  %v2869_v1 = vmax.f32 %v2837_v61, 0.0  ;;  %v2806_v41 = vadd.f32 %v5296_v55, %v2767_v16  ;;  %v3002_v4 = vld [vmem:[%s4057_s17 + $0xf8] sm:$0xff] }
 0x34d   : > { %v2725_v29 = vpop.f32.mrf.mxu1 }
 0x34e   : > { %3059 = vst [vmem:[%s5318_s27 + $0xc0] sm:$0xff] %v3027_v13  ;;  %v2964_v30 = vmul.f32 0.16666667, %v2932_v46  ;;  %v2901_v62 = vmin.f32 %v2869_v1, 6.0  ;;  %v2838_v21 = vadd.f32 3.0, %v2806_v41  ;;  %v2768_v50 = vadd.f32 %v2725_v29, %v5287_v6 }
 0x34f   : > { %v2727_v43 = vpop.f32.mrf.mxu1 }
 0x350   : > { %v3028_v27 = vadd.f32 %v2996_v59, %v2964_v30  ;;  %v2933_v5 = vmul.f32 %v2901_v62, %v2805_v9  ;;  %v2870_v24 = vmax.f32 %v2838_v21, 0.0  ;;  %v2807_v45 = vadd.f32 %v5296_v55, %v2768_v50 }
 0x351   : > { %v2728_v0 = vpop.f32.mrf.mxu1 }
 0x352   : > { %3060 = vst [vmem:[%s5318_s27 + $0xc8] sm:$0xff] %v3028_v27  ;;  %v2965_v11 = vmul.f32 0.16666667, %v2933_v5  ;;  %v2902_v47 = vmin.f32 %v2870_v24, 6.0  ;;  %v2839_v18 = vadd.f32 3.0, %v2807_v45  ;;  %v2769_v40 = vadd.f32 %v2728_v0, %v5289_v34 }
 0x353   : > { %v2730_v15 = vpop.f32.mrf.mxu1 }
 0x354   : > { %v3029_v10 = vadd.f32 %v2997_v23, %v2965_v11  ;;  %v2934_v6 = vmul.f32 %v2902_v47, %v2806_v41  ;;  %v2871_v36 = vmax.f32 %v2839_v18, 0.0  ;;  %v2808_v7 = vadd.f32 %v5296_v55, %v2769_v40 }
 0x355   : > { %v2733_v48 = vpop.f32.mrf.mxu1 }
 0x356   : > { %3061 = vst [vmem:[%s5318_s27 + $0xd0] sm:$0xff] %v3029_v10  ;;  %v2966_v33 = vmul.f32 0.16666667, %v2934_v6  ;;  %v2903_v31 = vmin.f32 %v2871_v36, 6.0  ;;  %v2840_v8 = vadd.f32 3.0, %v2808_v7  ;;  %v2770_v63 = vadd.f32 %v2733_v48, %v5298_v60 }
 0x357   : > { %v2735_v32 = vpop.f32.mrf.mxu1 }
 0x358   : > { %v3030_v49 = vadd.f32 %v2998_v52, %v2966_v33  ;;  %v2935_v34 = vmul.f32 %v2903_v31, %v2807_v45  ;;  %v2872_v38 = vmax.f32 %v2840_v8, 0.0  ;;  %v2809_v19 = vadd.f32 %v5296_v55, %v2770_v63 }
 0x359   : > { %v2736_v54 = vpop.f32.mrf.mxu1 }
 0x35a   : > { %3062 = vst [vmem:[%s5318_s27 + $0xd8] sm:$0xff] %v3030_v49  ;;  %v2967_v39 = vmul.f32 0.16666667, %v2935_v34  ;;  %v2904_v26 = vmin.f32 %v2872_v38, 6.0  ;;  %v2841_v12 = vadd.f32 3.0, %v2809_v19  ;;  %v2771_v25 = vadd.f32 %v2736_v54, %v5303_v20  ;;  %v3001_v20 = vld [vmem:[%s4057_s17 + $0xf0] sm:$0xff] }
 0x35b   : > { %v2738_v44 = vpop.f32.mrf.mxu1  ;;  %s3828_s17 = sshll.u32 %s3902_s22, 4  ;;  %s3829_s17 = int_to_ptr.vmem [resolvable:$false] %s3828_s17 }
 0x35c   : > { %v3031_v60 = vadd.f32 %v2999_v2, %v2967_v39  ;;  %v2936_v53 = vmul.f32 %v2904_v26, %v2808_v7  ;;  %v2873_v56 = vmax.f32 %v2841_v12, 0.0  ;;  %v2810_v3 = vadd.f32 %v5296_v55, %v2771_v25  ;;  %s3830_s6 = scalar_lea.vmem %s3829_s17, 8192  ;;  %p3831_p10 = scmp.lt.s32.totalorder %s5440_s28, %s3829_s17 }
 0x35d   : > { %p3832_p2 = scmp.lt.s32.totalorder %s3830_s6, %s3824_s29 }
 0x35e   : > { %3063 = vst [vmem:[%s5318_s27 + $0xe0] sm:$0xff] %v3031_v60  ;;  %v2968_v57 = vmul.f32 0.16666667, %v2936_v53  ;;  %v2905_v14 = vmin.f32 %v2873_v56, 6.0  ;;  %v2842_v58 = vadd.f32 3.0, %v2810_v3 }
 0x35f   : > { %p3833_p13 = por %p3832_p2, %p3831_p10 }
 0x360   : > { %v3032_v37 = vadd.f32 %v3000_v35, %v2968_v57  ;;  %v2937_v17 = vmul.f32 %v2905_v14, %v2809_v19  ;;  %v2874_v9 = vmax.f32 %v2842_v58, 0.0 }
 0x361   : > { %p3834_p0 = pnand %p3833_p13, %p3827_p12 }
 0x362   : > { %3064 = vst [vmem:[%s5318_s27 + $0xe8] sm:$0xff] %v3032_v37  ;;  %v2969_v51 = vmul.f32 0.16666667, %v2937_v17  ;;  %v2906_v28 = vmin.f32 %v2874_v9, 6.0 }
 0x364   : > { %v3033_v22 = vadd.f32 %v3001_v20, %v2969_v51  ;;  %v2938_v55 = vmul.f32 %v2906_v28, %v2810_v3 }
 0x366   : > { %3065 = vst [vmem:[%s5318_s27 + $0xf0] sm:$0xff] %v3033_v22  ;;  %v2970_v61 = vmul.f32 0.16666667, %v2938_v55 }
 0x368   : > { %v3034_v16 = vadd.f32 %v3002_v4, %v2970_v61 }
 0x36a   : > { %3066 = vst [vmem:[%s5318_s27 + $0xf8] sm:$0xff] %v3034_v16 }
 0x36b   : > { %3837 = shalt.err (!%p3834_p0)
}
 0x36c   : > { %s3838_s7 = scalar_lea.hbm %s5438_s16, 4096  ;;  %s3842_s15 = scalar_lea.hbm %s5489_s5, 8192 }
 0x36d   : > { %p3839_p5 = scmp.ne.s32.totalorder %s5438_s16, %s3838_s7  ;;  %p3843_p4 = scmp.lt.s32.totalorder %s5438_s16, %s5489_s5 }
 0x36e   : > { %p3844_p6 = scmp.lt.s32.totalorder %s3842_s15, %s3838_s7 }
 0x36f   : > { %p3840_p9 = pnand %p3839_p5, %p5634_p11 }
 0x370   : > { %p3845_p8 = por %p3844_p6, %p3843_p4 }
 0x371   : > { %p3841_p1 = pneg %p3840_p9 }
 0x373   : > { %p3846_p3 = pnand %p3845_p8, %p3841_p1 }
 0x375   : > { %3849 = shalt.err (!%p3846_p3)
}
 0x376   : > { %s3903_s12 = smov 128   ;;  %s3904_s9 = smov 8  }
 0x377   : > { %3538 = dma.vmem_to_hbm [thread:$0]  (%p5634_p11), %s5440_s28, 4096, %s5438_s16, %s3068_s26, %s3903_s12, %s3903_s12, %s3904_s9  }
 0x378 PF: > { %s3096_s10 = sand.u32 1, %s3880_s18   ;;  %p5635_p7 = scmp.ne.s32.totalorder %s5505_s25, 0 }
 0x379   : > { %p5636_p12 = scmp.ge.s32.totalorder %s3892_s21, 2  ;;  %s3097_s29 = scalar_lea.sflag [#allocation5], %s3096_s10 }
 0x37b   : > { %p3549_p10 = pnand %p5636_p12, %p5635_p7 }
 0x37d   : > { %p3550_p2 = pneg %p3549_p10 }
 0x37f   : > { %3875 = dma.done.wait (%p3550_p2), %s3097_s29, 4096  }
 0x380   : > { %3877 = vsyncadd (%p3550_p2), %s3097_s29, 4294963200  ;;  %p19_p13 = scmp.ge.s32.totalorder %s3989_s30, 4   ;;  %s5637_s18 = smov %s3884_s19 }
 0x381   : > { %s5638_s19 = smov %s3888_s20  ;;  %s5639_s20 = smov %s4006_s13 }
 0x382   : > { %s5640_s21 = smov %s3989_s30  ;;  %21 = sbr.rel (!%p19_p13) target bundleno = 6 (0x6), region = 94 }
 0x387   :  { %3102 = vsyncpa [#allocation4], 1 }
 0x388   :  { %3104 = vsyncpa [#allocation4 + $0x1], 1 }
 0x389   :  { %3105 = vsyncpa [#allocation7], 1 }
 0x38a   :  { %3106 = vsyncpa [#allocation5], 1 }
 0x38b   :  { %3108 = vsyncpa [#allocation5 + $0x1], 1 }

</bundles_post_ra>
